<compile_context>
chip_gen: v5e
topology: v5e:2x2
jax: 0.10.0
libtpu: 0.0.40
codegen_flags: <defaults>
</compile_context>

<pallas_src>
import jax
import jax.numpy as jnp
from jax.experimental import pallas as pl
from jax.experimental.pallas import tpu as pltpu

BN_EPS = 1e-5
_VMEM_LIMIT_BYTES = 48 * 1024 * 1024  # explicit scoped-VMEM cap, safe on v5e/v6e/v7x


def _pick_th(h: int) -> int:
    """Row-stripe height: largest of (64,32,16,8) that divides H (and < H), else H."""
    for cand in (64, 32, 16, 8):
        if cand < h and h % cand == 0:
            return cand
    return h


# ----------------------------------------------------------------------------
# Kernel 1: Conv3x3 (reflect pad) + bias + ReLU, emitting per-tile BN partial stats
# ----------------------------------------------------------------------------
def _conv3x3_relu_stats_kernel(x_top_ref, x_mid_ref, x_bot_ref, w_ref, b_ref,
                               y_ref, stats_ref):
    # x_top/x_bot: (1, 1, W, Cin) halo rows (already reflected at image borders
    #              by the index_map).  x_mid: (1, TH, W, Cin) stripe body.
    # w_ref: (9*Cin, Cout) bf16 im2col weight.  b_ref: (1, Cout) f32.
    # y_ref: (1, TH, W, Cout).  stats_ref: (1, 1, 2, Cout) f32  [row0=sum, row1=sum_sq].
    _, th, wdim, cin = x_mid_ref.shape
    cout = y_ref.shape[-1]

    x_top = x_top_ref[0].astype(jnp.bfloat16)   # (1, W, Cin)
    x_mid = x_mid_ref[0].astype(jnp.bfloat16)   # (TH, W, Cin)
    x_bot = x_bot_ref[0].astype(jnp.bfloat16)   # (1, W, Cin)

    # H halo (rows) then in-kernel reflect pad along W (columns).
    xh = jnp.concatenate([x_top, x_mid, x_bot], axis=0)                  # (TH+2, W, Cin)
    xp = jnp.concatenate(
        [xh[:, 1:2, :], xh, xh[:, wdim - 2:wdim - 1, :]], axis=1)        # (TH+2, W+2, Cin)

    # im2col: 9 shifted views concatenated along the channel (lane) axis -> one MXU dot.
    cols = [xp[dy:dy + th, dx:dx + wdim, :] for dy in range(3) for dx in range(3)]
    patches = jnp.concatenate(cols, axis=-1).reshape(th * wdim, 9 * cin)  # bf16

    acc = jnp.dot(patches, w_ref[...], preferred_element_type=jnp.float32)  # (TH*W, Cout) f32
    acc = jnp.maximum(acc + b_ref[...], 0.0)                                 # bias + ReLU (f32)

    y_ref[...] = acc.reshape(1, th, wdim, cout).astype(y_ref.dtype)

    psum = jnp.sum(acc, axis=0, keepdims=True)          # (1, Cout)
    psq = jnp.sum(acc * acc, axis=0, keepdims=True)     # (1, Cout)
    stats_ref[...] = jnp.concatenate([psum, psq], axis=0).reshape(1, 1, 2, cout)


def conv3x3_relu_stats(x, w_mat, b_row, *, out_dtype, th):
    """x: (N,H,W,Cin) NHWC.  w_mat: (9*Cin, Cout) bf16.  b_row: (1, Cout) f32."""
    N, H, W, Cin = x.shape
    KC, Cout = w_mat.shape
    assert KC == 9 * Cin and H % th == 0
    nH = H // th

    def main_map(n, i):
        return (n, i, 0, 0)

    def top_map(n, i):
        r = i * th - 1                       # row above the stripe
        return (n, jnp.where(r < 0, 1, r), 0, 0)          # reflect: row -1 -> row 1

    def bot_map(n, i):
        r = i * th + th                      # row below the stripe
        return (n, jnp.where(r > H - 1, H - 2, r), 0, 0)  # reflect: row H -> row H-2

    in_specs = [
        pl.BlockSpec((1, 1, W, Cin), top_map),
        pl.BlockSpec((1, th, W, Cin), main_map),
        pl.BlockSpec((1, 1, W, Cin), bot_map),
        pl.BlockSpec((KC, Cout), lambda n, i: (0, 0)),
        pl.BlockSpec((1, Cout), lambda n, i: (0, 0)),
    ]
    out_specs = [
        pl.BlockSpec((1, th, W, Cout), main_map),
        pl.BlockSpec((1, 1, 2, Cout), lambda n, i: (n, i, 0, 0)),
    ]
    out_shape = (
        jax.ShapeDtypeStruct((N, H, W, Cout), out_dtype),
        jax.ShapeDtypeStruct((N, nH, 2, Cout), jnp.float32),
    )
    y, stats = pl.pallas_call(
        _conv3x3_relu_stats_kernel,
        grid_spec=pltpu.PrefetchScalarGridSpec(
            num_scalar_prefetch=0, grid=(N, nH),
            in_specs=in_specs, out_specs=out_specs),
        out_shape=out_shape,
        compiler_params=pltpu.CompilerParams(
            dimension_semantics=("parallel", "parallel"),
            vmem_limit_bytes=_VMEM_LIMIT_BYTES),
    )(x, x, x, w_mat, b_row)
    return y, stats


# ----------------------------------------------------------------------------
# Kernel 2: per-channel affine (applies the final BatchNorm), tiled & pipelined
# ----------------------------------------------------------------------------
def _affine_kernel(y_ref, scale_ref, shift_ref, o_ref):
    y = y_ref[...].astype(jnp.float32)
    o_ref[...] = (y * scale_ref[...] + shift_ref[...]).astype(o_ref.dtype)


def affine_normalize(y, scale_row, shift_row, *, th, out_dtype=jnp.float32):
    N, H, W, C = y.shape
    nH = H // th
    main = pl.BlockSpec((1, th, W, C), lambda n, i: (n, i, 0, 0))
    vec = pl.BlockSpec((1, C), lambda n, i: (0, 0))
    return pl.pallas_call(
        _affine_kernel,
        grid_spec=pltpu.PrefetchScalarGridSpec(
            num_scalar_prefetch=0, grid=(N, nH),
            in_specs=[main, vec, vec], out_specs=main),
        out_shape=jax.ShapeDtypeStruct((N, H, W, C), out_dtype),
        compiler_params=pltpu.CompilerParams(
            dimension_semantics=("parallel", "parallel"),
            vmem_limit_bytes=_VMEM_LIMIT_BYTES),
    )(y, scale_row, shift_row)


# ----------------------------------------------------------------------------
# BatchNorm statistics (training-mode: biased variance over N*H*W) from partial sums
# ----------------------------------------------------------------------------
def _bn_scale_shift(stats, count, gamma, beta):
    s = jnp.sum(stats[:, :, 0, :], axis=(0, 1))
    ss = jnp.sum(stats[:, :, 1, :], axis=(0, 1))
    mean = s / count
    # Clamp guards the E[x^2]-mean^2 cancellation noted in the review.
    var = jnp.maximum(ss / count - mean * mean, 0.0)
    inv = jax.lax.rsqrt(var + BN_EPS)
    scale = gamma * inv
    shift = beta - mean * scale
    return scale, shift            # (C,), (C,)


# ----------------------------------------------------------------------------
# Block forward (NHWC core + NCHW wrapper matching the PyTorch module)
# ----------------------------------------------------------------------------
def block_forward_nhwc(x, p):
    N, H, W, Cin = x.shape
    Cout = p["w1"].shape[-1]
    th = _pick_th(H)
    count = float(N * H * W)

    # --- conv1 + ReLU (+ BN1 partial stats) ---
    w1m = p["w1"].reshape(9 * Cin, Cout).astype(jnp.bfloat16)
    y1, st1 = conv3x3_relu_stats(x, w1m, p["b1"].reshape(1, -1),
                                 out_dtype=jnp.bfloat16, th=th)
    sc1, sh1 = _bn_scale_shift(st1, count, p["g1"], p["be1"])

    # --- fold BN1 affine into conv2 (conv is linear; reflect pad commutes with
    #     a per-channel affine), then conv2 + ReLU (+ BN2 partial stats) ---
    w2_eff = p["w2"] * sc1.reshape(1, 1, -1, 1)
    b2_eff = p["b2"] + jnp.einsum("ijkl,k->l", p["w2"], sh1)
    w2m = w2_eff.reshape(9 * Cout, Cout).astype(jnp.bfloat16)
    y2, st2 = conv3x3_relu_stats(y1, w2m, b2_eff.reshape(1, -1),
                                 out_dtype=jnp.bfloat16, th=th)
    sc2, sh2 = _bn_scale_shift(st2, count, p["g2"], p["be2"])

    # --- BN2 normalize (final output of the Block) ---
    return affine_normalize(y2, sc2.reshape(1, -1), sh2.reshape(1, -1),
                            th=th, out_dtype=jnp.float32)


def block_forward(x_nchw, p):
    x = jnp.transpose(x_nchw, (0, 2, 3, 1))     # single NCHW->NHWC at the boundary
    y = block_forward_nhwc(x, p)
    return jnp.transpose(y, (0, 3, 1, 2))


# ----------------------------------------------------------------------------
# Deterministic parameter init (shapes per the PyTorch module __init__)
# ----------------------------------------------------------------------------
def init_block_params(key, in_ch, out_ch):
    k1, k2, k3, k4 = jax.random.split(key, 4)
    return {
        # conv weights stored HWIO: (kh, kw, Cin, Cout)
        "w1": 0.1 * jax.random.normal(k1, (3, 3, in_ch, out_ch), jnp.float32),
        "b1": 0.05 * jax.random.normal(k3, (out_ch,), jnp.float32),
        "g1": jnp.ones((out_ch,), jnp.float32),    # BN gamma init = 1
        "be1": jnp.zeros((out_ch,), jnp.float32),  # BN beta  init = 0
        "w2": 0.1 * jax.random.normal(k2, (3, 3, out_ch, out_ch), jnp.float32),
        "b2": 0.05 * jax.random.normal(k4, (out_ch,), jnp.float32),
        "g2": jnp.ones((out_ch,), jnp.float32),
        "be2": jnp.zeros((out_ch,), jnp.float32),
    }


# ----------------------------------------------------------------------------
# Pure-JAX reference (f32) for a correctness sanity check
# ----------------------------------------------------------------------------
def _block_ref(x_nchw, p):
    x = jnp.transpose(x_nchw, (0, 2, 3, 1)).astype(jnp.float32)

    def conv_relu_bn(x, w, b, g, be):
        xp = jnp.pad(x, ((0, 0), (1, 1), (1, 1), (0, 0)), mode="reflect")
        y = jax.lax.conv_general_dilated(
            xp, w, window_strides=(1, 1), padding="VALID",
            dimension_numbers=("NHWC", "HWIO", "NHWC"))
        y = jnp.maximum(y + b, 0.0)
        mean = jnp.mean(y, axis=(0, 1, 2))
        var = jnp.mean((y - mean) ** 2, axis=(0, 1, 2))
        return (y - mean) * jax.lax.rsqrt(var + BN_EPS) * g + be

    y = conv_relu_bn(x, p["w1"], p["b1"], p["g1"], p["be1"])
    y = conv_relu_bn(y, p["w2"], p["b2"], p["g2"], p["be2"])
    return jnp.transpose(y, (0, 3, 1, 2))


# ----------------------------------------------------------------------------
if __name__ == "__main__":
    key = jax.random.PRNGKey(0)
    kx, kp = jax.random.split(key)

    N, in_ch, out_ch, H, W = 2, 4, 32, 16, 16
    x = jax.random.normal(kx, (N, in_ch, H, W), jnp.float32)  # NCHW like PyTorch
    params = init_block_params(kp, in_ch, out_ch)

    out = jax.jit(block_forward)(x, params)
    out = jax.block_until_ready(out)
    assert out.shape == (N, out_ch, H, W), out.shape

    ref = _block_ref(x, params)
    max_err = float(jnp.max(jnp.abs(out - ref)))
    # bf16 MXU operands / intermediates -> loose tolerance vs the f32 reference.
    assert max_err < 0.25, f"max abs err vs reference: {max_err}"

    print("KERNEL_OK")
</pallas_src>

<mosaic_0001>
module attributes {stable_mosaic.version = 11 : i64} {
  func.func @_conv3x3_relu_stats_kernel(%arg0: i32, %arg1: i32, %arg2: memref<1x1x16x4xf32, #tpu.memory_space<vmem>>, %arg3: memref<1x8x16x4xf32, #tpu.memory_space<vmem>>, %arg4: memref<1x1x16x4xf32, #tpu.memory_space<vmem>>, %arg5: memref<36x32xbf16, #tpu.memory_space<vmem>>, %arg6: memref<1x32xf32, #tpu.memory_space<vmem>>, %arg7: memref<1x8x16x32xbf16, #tpu.memory_space<vmem>>, %arg8: memref<1x1x2x32xf32, #tpu.memory_space<vmem>>) attributes {dimension_semantics = [#tpu.dimension_semantics<parallel>, #tpu.dimension_semantics<parallel>], iteration_bounds = array<i64: 2, 2>, scalar_prefetch = 0 : i64, scratch_operands = 0 : i64, tpu.core_type = #tpu.core_type<tc>, window_params = [{transform_indices = @transform_0, window_bounds = array<i64: 1, 1, 16, 4>}, {transform_indices = @transform_1, window_bounds = array<i64: 1, 8, 16, 4>}, {transform_indices = @transform_2, window_bounds = array<i64: 1, 1, 16, 4>}, {pipeline_mode = #tpu.pipeline_mode<synchronous>, transform_indices = @transform_3, window_bounds = array<i64: 36, 32>}, {pipeline_mode = #tpu.pipeline_mode<synchronous>, transform_indices = @transform_4, window_bounds = array<i64: 1, 32>}, {transform_indices = @transform_5, window_bounds = array<i64: 1, 8, 16, 32>}, {transform_indices = @transform_6, window_bounds = array<i64: 1, 1, 2, 32>}]} {
    %c0 = arith.constant 0 : index
    %c0_0 = arith.constant 0 : index
    %c0_1 = arith.constant 0 : index
    %c0_2 = arith.constant 0 : index
    %0 = vector.load %arg2[%c0, %c0_0, %c0_1, %c0_2] : memref<1x1x16x4xf32, #tpu.memory_space<vmem>>, vector<1x1x16x4xf32>
    %1 = vector.shape_cast %0 : vector<1x1x16x4xf32> to vector<1x16x4xf32>
    %2 = arith.truncf %1 : vector<1x16x4xf32> to vector<1x16x4xbf16>
    %c0_3 = arith.constant 0 : index
    %c0_4 = arith.constant 0 : index
    %c0_5 = arith.constant 0 : index
    %c0_6 = arith.constant 0 : index
    %3 = vector.load %arg3[%c0_3, %c0_4, %c0_5, %c0_6] : memref<1x8x16x4xf32, #tpu.memory_space<vmem>>, vector<1x8x16x4xf32>
    %4 = vector.shape_cast %3 : vector<1x8x16x4xf32> to vector<8x16x4xf32>
    %5 = arith.truncf %4 : vector<8x16x4xf32> to vector<8x16x4xbf16>
    %c0_7 = arith.constant 0 : index
    %c0_8 = arith.constant 0 : index
    %c0_9 = arith.constant 0 : index
    %c0_10 = arith.constant 0 : index
    %6 = vector.load %arg4[%c0_7, %c0_8, %c0_9, %c0_10] : memref<1x1x16x4xf32, #tpu.memory_space<vmem>>, vector<1x1x16x4xf32>
    %7 = vector.shape_cast %6 : vector<1x1x16x4xf32> to vector<1x16x4xf32>
    %8 = arith.truncf %7 : vector<1x16x4xf32> to vector<1x16x4xbf16>
    %9 = tpu.concatenate %2, %5, %8 in 0 : vector<1x16x4xbf16>, vector<8x16x4xbf16>, vector<1x16x4xbf16> -> vector<10x16x4xbf16>
    %10 = vector.extract_strided_slice %9 {offsets = [0, 1, 0], sizes = [10, 1, 4], strides = [1, 1, 1]} : vector<10x16x4xbf16> to vector<10x1x4xbf16>
    %11 = vector.extract_strided_slice %9 {offsets = [0, 14, 0], sizes = [10, 1, 4], strides = [1, 1, 1]} : vector<10x16x4xbf16> to vector<10x1x4xbf16>
    %12 = tpu.concatenate %10, %9, %11 in 1 : vector<10x1x4xbf16>, vector<10x16x4xbf16>, vector<10x1x4xbf16> -> vector<10x18x4xbf16>
    %13 = vector.extract_strided_slice %12 {offsets = [0, 0, 0], sizes = [8, 16, 4], strides = [1, 1, 1]} : vector<10x18x4xbf16> to vector<8x16x4xbf16>
    %14 = vector.extract_strided_slice %12 {offsets = [0, 1, 0], sizes = [8, 16, 4], strides = [1, 1, 1]} : vector<10x18x4xbf16> to vector<8x16x4xbf16>
    %15 = vector.extract_strided_slice %12 {offsets = [0, 2, 0], sizes = [8, 16, 4], strides = [1, 1, 1]} : vector<10x18x4xbf16> to vector<8x16x4xbf16>
    %16 = vector.extract_strided_slice %12 {offsets = [1, 0, 0], sizes = [8, 16, 4], strides = [1, 1, 1]} : vector<10x18x4xbf16> to vector<8x16x4xbf16>
    %17 = vector.extract_strided_slice %12 {offsets = [1, 1, 0], sizes = [8, 16, 4], strides = [1, 1, 1]} : vector<10x18x4xbf16> to vector<8x16x4xbf16>
    %18 = vector.extract_strided_slice %12 {offsets = [1, 2, 0], sizes = [8, 16, 4], strides = [1, 1, 1]} : vector<10x18x4xbf16> to vector<8x16x4xbf16>
    %19 = vector.extract_strided_slice %12 {offsets = [2, 0, 0], sizes = [8, 16, 4], strides = [1, 1, 1]} : vector<10x18x4xbf16> to vector<8x16x4xbf16>
    %20 = vector.extract_strided_slice %12 {offsets = [2, 1, 0], sizes = [8, 16, 4], strides = [1, 1, 1]} : vector<10x18x4xbf16> to vector<8x16x4xbf16>
    %21 = vector.extract_strided_slice %12 {offsets = [2, 2, 0], sizes = [8, 16, 4], strides = [1, 1, 1]} : vector<10x18x4xbf16> to vector<8x16x4xbf16>
    %22 = tpu.concatenate %13, %14, %15, %16, %17, %18, %19, %20, %21 in 2 : vector<8x16x4xbf16>, vector<8x16x4xbf16>, vector<8x16x4xbf16>, vector<8x16x4xbf16>, vector<8x16x4xbf16>, vector<8x16x4xbf16>, vector<8x16x4xbf16>, vector<8x16x4xbf16>, vector<8x16x4xbf16> -> vector<8x16x36xbf16>
    %23 = vector.shape_cast %22 : vector<8x16x36xbf16> to vector<128x36xbf16>
    %c0_11 = arith.constant 0 : index
    %c0_12 = arith.constant 0 : index
    %24 = vector.load %arg5[%c0_11, %c0_12] : memref<36x32xbf16, #tpu.memory_space<vmem>>, vector<36x32xbf16>
    %cst = arith.constant dense<0.000000e+00> : vector<128x32xf32>
    %25 = tpu.matmul %23, %24, %cst {dimension_numbers = #tpu.dot_dimension_numbers<[1], [0], [0], [1], [0, 0, 1, 1], [], []>} : vector<128x36xbf16>, vector<36x32xbf16>, vector<128x32xf32> -> vector<128x32xf32>
    %c0_13 = arith.constant 0 : index
    %c0_14 = arith.constant 0 : index
    %26 = vector.load %arg6[%c0_13, %c0_14] : memref<1x32xf32, #tpu.memory_space<vmem>>, vector<1x32xf32>
    %27 = vector.broadcast %26 : vector<1x32xf32> to vector<128x32xf32>
    %28 = arith.addf %25, %27 : vector<128x32xf32>
    %cst_15 = arith.constant 0.000000e+00 : f32
    %29 = vector.broadcast %cst_15 : f32 to vector<128x32xf32>
    %30 = arith.maximumf %28, %29 : vector<128x32xf32>
    %31 = vector.shape_cast %30 : vector<128x32xf32> to vector<1x8x16x32xf32>
    %32 = arith.truncf %31 : vector<1x8x16x32xf32> to vector<1x8x16x32xbf16>
    %c0_16 = arith.constant 0 : index
    %c0_17 = arith.constant 0 : index
    %c0_18 = arith.constant 0 : index
    %c0_19 = arith.constant 0 : index
    %33 = vector.load %arg7[%c0_16, %c0_17, %c0_18, %c0_19] : memref<1x8x16x32xbf16, #tpu.memory_space<vmem>>, vector<1x8x16x32xbf16>
    tpu.vector_store %arg7[%c0_16, %c0_17, %c0_18, %c0_19], %32 {strides = array<i32>} : memref<1x8x16x32xbf16, #tpu.memory_space<vmem>>, vector<1x8x16x32xbf16>,
    %cst_20 = arith.constant dense<0.000000e+00> : vector<32xf32>
    %34 = vector.multi_reduction <add>, %30, %cst_20 [0] : vector<128x32xf32> to vector<32xf32>
    %35 = vector.shape_cast %34 : vector<32xf32> to vector<1x32xf32>
    %36 = arith.mulf %30, %30 : vector<128x32xf32>
    %cst_21 = arith.constant dense<0.000000e+00> : vector<32xf32>
    %37 = vector.multi_reduction <add>, %36, %cst_21 [0] : vector<128x32xf32> to vector<32xf32>
    %38 = vector.shape_cast %37 : vector<32xf32> to vector<1x32xf32>
    %39 = tpu.concatenate %35, %38 in 0 : vector<1x32xf32>, vector<1x32xf32> -> vector<2x32xf32>
    %40 = vector.shape_cast %39 : vector<2x32xf32> to vector<1x1x2x32xf32>
    %c0_22 = arith.constant 0 : index
    %c0_23 = arith.constant 0 : index
    %c0_24 = arith.constant 0 : index
    %c0_25 = arith.constant 0 : index
    %41 = vector.load %arg8[%c0_22, %c0_23, %c0_24, %c0_25] : memref<1x1x2x32xf32, #tpu.memory_space<vmem>>, vector<1x1x2x32xf32>
    tpu.vector_store %arg8[%c0_22, %c0_23, %c0_24, %c0_25], %40 {strides = array<i32>} : memref<1x1x2x32xf32, #tpu.memory_space<vmem>>, vector<1x1x2x32xf32>,
    return
  }
  func.func @transform_0(%arg0: i32, %arg1: i32) -> (i32, i32, i32, i32) {
    %c8_i32 = arith.constant 8 : i32
    %0 = arith.muli %arg1, %c8_i32 : i32
    %c1_i32 = arith.constant 1 : i32
    %1 = arith.subi %0, %c1_i32 : i32
    %c0_i32 = arith.constant 0 : i32
    %2 = arith.cmpi slt, %1, %c0_i32 : i32
    %c1_i32_0 = arith.constant 1 : i32
    %3 = arith.select %2, %c1_i32_0, %1 : i32
    %c0_i32_1 = arith.constant 0 : i32
    %c0_i32_2 = arith.constant 0 : i32
    %c0_i32_3 = arith.constant 0 : i32
    return %arg0, %3, %c0_i32_1, %c0_i32_2 : i32, i32, i32, i32
  }
  func.func @transform_1(%arg0: i32, %arg1: i32) -> (i32, i32, i32, i32) {
    %c0_i32 = arith.constant 0 : i32
    %c0_i32_0 = arith.constant 0 : i32
    %c0_i32_1 = arith.constant 0 : i32
    return %arg0, %arg1, %c0_i32, %c0_i32_0 : i32, i32, i32, i32
  }
  func.func @transform_2(%arg0: i32, %arg1: i32) -> (i32, i32, i32, i32) {
    %c8_i32 = arith.constant 8 : i32
    %0 = arith.muli %arg1, %c8_i32 : i32
    %c8_i32_0 = arith.constant 8 : i32
    %1 = arith.addi %0, %c8_i32_0 : i32
    %c15_i32 = arith.constant 15 : i32
    %2 = arith.cmpi sgt, %1, %c15_i32 : i32
    %c14_i32 = arith.constant 14 : i32
    %3 = arith.select %2, %c14_i32, %1 : i32
    %c0_i32 = arith.constant 0 : i32
    %c0_i32_1 = arith.constant 0 : i32
    %c0_i32_2 = arith.constant 0 : i32
    return %arg0, %3, %c0_i32, %c0_i32_1 : i32, i32, i32, i32
  }
  func.func @transform_3(%arg0: i32, %arg1: i32) -> (i32, i32) {
    %c0_i32 = arith.constant 0 : i32
    %c0_i32_0 = arith.constant 0 : i32
    %c0_i32_1 = arith.constant 0 : i32
    return %c0_i32, %c0_i32_0 : i32, i32
  }
  func.func @transform_4(%arg0: i32, %arg1: i32) -> (i32, i32) {
    %c0_i32 = arith.constant 0 : i32
    %c0_i32_0 = arith.constant 0 : i32
    %c0_i32_1 = arith.constant 0 : i32
    return %c0_i32, %c0_i32_0 : i32, i32
  }
  func.func @transform_5(%arg0: i32, %arg1: i32) -> (i32, i32, i32, i32) {
    %c0_i32 = arith.constant 0 : i32
    %c0_i32_0 = arith.constant 0 : i32
    %c0_i32_1 = arith.constant 0 : i32
    return %arg0, %arg1, %c0_i32, %c0_i32_0 : i32, i32, i32, i32
  }
  func.func @transform_6(%arg0: i32, %arg1: i32) -> (i32, i32, i32, i32) {
    %c0_i32 = arith.constant 0 : i32
    %c0_i32_0 = arith.constant 0 : i32
    %c0_i32_1 = arith.constant 0 : i32
    return %arg0, %arg1, %c0_i32, %c0_i32_0 : i32, i32, i32, i32
  }
}

module attributes {stable_mosaic.version = 11 : i64} {
  func.func @_conv3x3_relu_stats_kernel(%arg0: i32, %arg1: i32, %arg2: memref<1x1x16x32xbf16, #tpu.memory_space<vmem>>, %arg3: memref<1x8x16x32xbf16, #tpu.memory_space<vmem>>, %arg4: memref<1x1x16x32xbf16, #tpu.memory_space<vmem>>, %arg5: memref<288x32xbf16, #tpu.memory_space<vmem>>, %arg6: memref<1x32xf32, #tpu.memory_space<vmem>>, %arg7: memref<1x8x16x32xbf16, #tpu.memory_space<vmem>>, %arg8: memref<1x1x2x32xf32, #tpu.memory_space<vmem>>) attributes {dimension_semantics = [#tpu.dimension_semantics<parallel>, #tpu.dimension_semantics<parallel>], iteration_bounds = array<i64: 2, 2>, scalar_prefetch = 0 : i64, scratch_operands = 0 : i64, tpu.core_type = #tpu.core_type<tc>, window_params = [{transform_indices = @transform_0, window_bounds = array<i64: 1, 1, 16, 32>}, {transform_indices = @transform_1, window_bounds = array<i64: 1, 8, 16, 32>}, {transform_indices = @transform_2, window_bounds = array<i64: 1, 1, 16, 32>}, {pipeline_mode = #tpu.pipeline_mode<synchronous>, transform_indices = @transform_3, window_bounds = array<i64: 288, 32>}, {pipeline_mode = #tpu.pipeline_mode<synchronous>, transform_indices = @transform_4, window_bounds = array<i64: 1, 32>}, {transform_indices = @transform_5, window_bounds = array<i64: 1, 8, 16, 32>}, {transform_indices = @transform_6, window_bounds = array<i64: 1, 1, 2, 32>}]} {
    %c0 = arith.constant 0 : index
    %c0_0 = arith.constant 0 : index
    %c0_1 = arith.constant 0 : index
    %c0_2 = arith.constant 0 : index
    %0 = vector.load %arg2[%c0, %c0_0, %c0_1, %c0_2] : memref<1x1x16x32xbf16, #tpu.memory_space<vmem>>, vector<1x1x16x32xbf16>
    %1 = vector.shape_cast %0 : vector<1x1x16x32xbf16> to vector<1x16x32xbf16>
    %c0_3 = arith.constant 0 : index
    %c0_4 = arith.constant 0 : index
    %c0_5 = arith.constant 0 : index
    %c0_6 = arith.constant 0 : index
    %2 = vector.load %arg3[%c0_3, %c0_4, %c0_5, %c0_6] : memref<1x8x16x32xbf16, #tpu.memory_space<vmem>>, vector<1x8x16x32xbf16>
    %3 = vector.shape_cast %2 : vector<1x8x16x32xbf16> to vector<8x16x32xbf16>
    %c0_7 = arith.constant 0 : index
    %c0_8 = arith.constant 0 : index
    %c0_9 = arith.constant 0 : index
    %c0_10 = arith.constant 0 : index
    %4 = vector.load %arg4[%c0_7, %c0_8, %c0_9, %c0_10] : memref<1x1x16x32xbf16, #tpu.memory_space<vmem>>, vector<1x1x16x32xbf16>
    %5 = vector.shape_cast %4 : vector<1x1x16x32xbf16> to vector<1x16x32xbf16>
    %6 = tpu.concatenate %1, %3, %5 in 0 : vector<1x16x32xbf16>, vector<8x16x32xbf16>, vector<1x16x32xbf16> -> vector<10x16x32xbf16>
    %7 = vector.extract_strided_slice %6 {offsets = [0, 1, 0], sizes = [10, 1, 32], strides = [1, 1, 1]} : vector<10x16x32xbf16> to vector<10x1x32xbf16>
    %8 = vector.extract_strided_slice %6 {offsets = [0, 14, 0], sizes = [10, 1, 32], strides = [1, 1, 1]} : vector<10x16x32xbf16> to vector<10x1x32xbf16>
    %9 = tpu.concatenate %7, %6, %8 in 1 : vector<10x1x32xbf16>, vector<10x16x32xbf16>, vector<10x1x32xbf16> -> vector<10x18x32xbf16>
    %10 = vector.extract_strided_slice %9 {offsets = [0, 0, 0], sizes = [8, 16, 32], strides = [1, 1, 1]} : vector<10x18x32xbf16> to vector<8x16x32xbf16>
    %11 = vector.extract_strided_slice %9 {offsets = [0, 1, 0], sizes = [8, 16, 32], strides = [1, 1, 1]} : vector<10x18x32xbf16> to vector<8x16x32xbf16>
    %12 = vector.extract_strided_slice %9 {offsets = [0, 2, 0], sizes = [8, 16, 32], strides = [1, 1, 1]} : vector<10x18x32xbf16> to vector<8x16x32xbf16>
    %13 = vector.extract_strided_slice %9 {offsets = [1, 0, 0], sizes = [8, 16, 32], strides = [1, 1, 1]} : vector<10x18x32xbf16> to vector<8x16x32xbf16>
    %14 = vector.extract_strided_slice %9 {offsets = [1, 1, 0], sizes = [8, 16, 32], strides = [1, 1, 1]} : vector<10x18x32xbf16> to vector<8x16x32xbf16>
    %15 = vector.extract_strided_slice %9 {offsets = [1, 2, 0], sizes = [8, 16, 32], strides = [1, 1, 1]} : vector<10x18x32xbf16> to vector<8x16x32xbf16>
    %16 = vector.extract_strided_slice %9 {offsets = [2, 0, 0], sizes = [8, 16, 32], strides = [1, 1, 1]} : vector<10x18x32xbf16> to vector<8x16x32xbf16>
    %17 = vector.extract_strided_slice %9 {offsets = [2, 1, 0], sizes = [8, 16, 32], strides = [1, 1, 1]} : vector<10x18x32xbf16> to vector<8x16x32xbf16>
    %18 = vector.extract_strided_slice %9 {offsets = [2, 2, 0], sizes = [8, 16, 32], strides = [1, 1, 1]} : vector<10x18x32xbf16> to vector<8x16x32xbf16>
    %19 = tpu.concatenate %10, %11, %12, %13, %14, %15, %16, %17, %18 in 2 : vector<8x16x32xbf16>, vector<8x16x32xbf16>, vector<8x16x32xbf16>, vector<8x16x32xbf16>, vector<8x16x32xbf16>, vector<8x16x32xbf16>, vector<8x16x32xbf16>, vector<8x16x32xbf16>, vector<8x16x32xbf16> -> vector<8x16x288xbf16>
    %20 = vector.shape_cast %19 : vector<8x16x288xbf16> to vector<128x288xbf16>
    %c0_11 = arith.constant 0 : index
    %c0_12 = arith.constant 0 : index
    %21 = vector.load %arg5[%c0_11, %c0_12] : memref<288x32xbf16, #tpu.memory_space<vmem>>, vector<288x32xbf16>
    %cst = arith.constant dense<0.000000e+00> : vector<128x32xf32>
    %22 = tpu.matmul %20, %21, %cst {dimension_numbers = #tpu.dot_dimension_numbers<[1], [0], [0], [1], [0, 0, 1, 1], [], []>} : vector<128x288xbf16>, vector<288x32xbf16>, vector<128x32xf32> -> vector<128x32xf32>
    %c0_13 = arith.constant 0 : index
    %c0_14 = arith.constant 0 : index
    %23 = vector.load %arg6[%c0_13, %c0_14] : memref<1x32xf32, #tpu.memory_space<vmem>>, vector<1x32xf32>
    %24 = vector.broadcast %23 : vector<1x32xf32> to vector<128x32xf32>
    %25 = arith.addf %22, %24 : vector<128x32xf32>
    %cst_15 = arith.constant 0.000000e+00 : f32
    %26 = vector.broadcast %cst_15 : f32 to vector<128x32xf32>
    %27 = arith.maximumf %25, %26 : vector<128x32xf32>
    %28 = vector.shape_cast %27 : vector<128x32xf32> to vector<1x8x16x32xf32>
    %29 = arith.truncf %28 : vector<1x8x16x32xf32> to vector<1x8x16x32xbf16>
    %c0_16 = arith.constant 0 : index
    %c0_17 = arith.constant 0 : index
    %c0_18 = arith.constant 0 : index
    %c0_19 = arith.constant 0 : index
    %30 = vector.load %arg7[%c0_16, %c0_17, %c0_18, %c0_19] : memref<1x8x16x32xbf16, #tpu.memory_space<vmem>>, vector<1x8x16x32xbf16>
    tpu.vector_store %arg7[%c0_16, %c0_17, %c0_18, %c0_19], %29 {strides = array<i32>} : memref<1x8x16x32xbf16, #tpu.memory_space<vmem>>, vector<1x8x16x32xbf16>,
    %cst_20 = arith.constant dense<0.000000e+00> : vector<32xf32>
    %31 = vector.multi_reduction <add>, %27, %cst_20 [0] : vector<128x32xf32> to vector<32xf32>
    %32 = vector.shape_cast %31 : vector<32xf32> to vector<1x32xf32>
    %33 = arith.mulf %27, %27 : vector<128x32xf32>
    %cst_21 = arith.constant dense<0.000000e+00> : vector<32xf32>
    %34 = vector.multi_reduction <add>, %33, %cst_21 [0] : vector<128x32xf32> to vector<32xf32>
    %35 = vector.shape_cast %34 : vector<32xf32> to vector<1x32xf32>
    %36 = tpu.concatenate %32, %35 in 0 : vector<1x32xf32>, vector<1x32xf32> -> vector<2x32xf32>
    %37 = vector.shape_cast %36 : vector<2x32xf32> to vector<1x1x2x32xf32>
    %c0_22 = arith.constant 0 : index
    %c0_23 = arith.constant 0 : index
    %c0_24 = arith.constant 0 : index
    %c0_25 = arith.constant 0 : index
    %38 = vector.load %arg8[%c0_22, %c0_23, %c0_24, %c0_25] : memref<1x1x2x32xf32, #tpu.memory_space<vmem>>, vector<1x1x2x32xf32>
    tpu.vector_store %arg8[%c0_22, %c0_23, %c0_24, %c0_25], %37 {strides = array<i32>} : memref<1x1x2x32xf32, #tpu.memory_space<vmem>>, vector<1x1x2x32xf32>,
    return
  }
  func.func @transform_0(%arg0: i32, %arg1: i32) -> (i32, i32, i32, i32) {
    %c8_i32 = arith.constant 8 : i32
    %0 = arith.muli %arg1, %c8_i32 : i32
    %c1_i32 = arith.constant 1 : i32
    %1 = arith.subi %0, %c1_i32 : i32
    %c0_i32 = arith.constant 0 : i32
    %2 = arith.cmpi slt, %1, %c0_i32 : i32
    %c1_i32_0 = arith.constant 1 : i32
    %3 = arith.select %2, %c1_i32_0, %1 : i32
    %c0_i32_1 = arith.constant 0 : i32
    %c0_i32_2 = arith.constant 0 : i32
    %c0_i32_3 = arith.constant 0 : i32
    return %arg0, %3, %c0_i32_1, %c0_i32_2 : i32, i32, i32, i32
  }
  func.func @transform_1(%arg0: i32, %arg1: i32) -> (i32, i32, i32, i32) {
    %c0_i32 = arith.constant 0 : i32
    %c0_i32_0 = arith.constant 0 : i32
    %c0_i32_1 = arith.constant 0 : i32
    return %arg0, %arg1, %c0_i32, %c0_i32_0 : i32, i32, i32, i32
  }
  func.func @transform_2(%arg0: i32, %arg1: i32) -> (i32, i32, i32, i32) {
    %c8_i32 = arith.constant 8 : i32
    %0 = arith.muli %arg1, %c8_i32 : i32
    %c8_i32_0 = arith.constant 8 : i32
    %1 = arith.addi %0, %c8_i32_0 : i32
    %c15_i32 = arith.constant 15 : i32
    %2 = arith.cmpi sgt, %1, %c15_i32 : i32
    %c14_i32 = arith.constant 14 : i32
    %3 = arith.select %2, %c14_i32, %1 : i32
    %c0_i32 = arith.constant 0 : i32
    %c0_i32_1 = arith.constant 0 : i32
    %c0_i32_2 = arith.constant 0 : i32
    return %arg0, %3, %c0_i32, %c0_i32_1 : i32, i32, i32, i32
  }
  func.func @transform_3(%arg0: i32, %arg1: i32) -> (i32, i32) {
    %c0_i32 = arith.constant 0 : i32
    %c0_i32_0 = arith.constant 0 : i32
    %c0_i32_1 = arith.constant 0 : i32
    return %c0_i32, %c0_i32_0 : i32, i32
  }
  func.func @transform_4(%arg0: i32, %arg1: i32) -> (i32, i32) {
    %c0_i32 = arith.constant 0 : i32
    %c0_i32_0 = arith.constant 0 : i32
    %c0_i32_1 = arith.constant 0 : i32
    return %c0_i32, %c0_i32_0 : i32, i32
  }
  func.func @transform_5(%arg0: i32, %arg1: i32) -> (i32, i32, i32, i32) {
    %c0_i32 = arith.constant 0 : i32
    %c0_i32_0 = arith.constant 0 : i32
    %c0_i32_1 = arith.constant 0 : i32
    return %arg0, %arg1, %c0_i32, %c0_i32_0 : i32, i32, i32, i32
  }
  func.func @transform_6(%arg0: i32, %arg1: i32) -> (i32, i32, i32, i32) {
    %c0_i32 = arith.constant 0 : i32
    %c0_i32_0 = arith.constant 0 : i32
    %c0_i32_1 = arith.constant 0 : i32
    return %arg0, %arg1, %c0_i32, %c0_i32_0 : i32, i32, i32, i32
  }
}

module attributes {stable_mosaic.version = 11 : i64} {
  func.func @_affine_kernel(%arg0: i32, %arg1: i32, %arg2: memref<1x8x16x32xbf16, #tpu.memory_space<vmem>>, %arg3: memref<1x32xf32, #tpu.memory_space<vmem>>, %arg4: memref<1x32xf32, #tpu.memory_space<vmem>>, %arg5: memref<1x8x16x32xf32, #tpu.memory_space<vmem>>) attributes {dimension_semantics = [#tpu.dimension_semantics<parallel>, #tpu.dimension_semantics<parallel>], iteration_bounds = array<i64: 2, 2>, scalar_prefetch = 0 : i64, scratch_operands = 0 : i64, tpu.core_type = #tpu.core_type<tc>, window_params = [{transform_indices = @transform_0, window_bounds = array<i64: 1, 8, 16, 32>}, {pipeline_mode = #tpu.pipeline_mode<synchronous>, transform_indices = @transform_1, window_bounds = array<i64: 1, 32>}, {pipeline_mode = #tpu.pipeline_mode<synchronous>, transform_indices = @transform_2, window_bounds = array<i64: 1, 32>}, {transform_indices = @transform_3, window_bounds = array<i64: 1, 8, 16, 32>}]} {
    %c0 = arith.constant 0 : index
    %c0_0 = arith.constant 0 : index
    %c0_1 = arith.constant 0 : index
    %c0_2 = arith.constant 0 : index
    %0 = vector.load %arg2[%c0, %c0_0, %c0_1, %c0_2] : memref<1x8x16x32xbf16, #tpu.memory_space<vmem>>, vector<1x8x16x32xbf16>
    %1 = arith.extf %0 : vector<1x8x16x32xbf16> to vector<1x8x16x32xf32>
    %c0_3 = arith.constant 0 : index
    %c0_4 = arith.constant 0 : index
    %2 = vector.load %arg3[%c0_3, %c0_4] : memref<1x32xf32, #tpu.memory_space<vmem>>, vector<1x32xf32>
    %3 = vector.shape_cast %2 : vector<1x32xf32> to vector<1x1x1x32xf32>
    %4 = vector.broadcast %3 : vector<1x1x1x32xf32> to vector<1x8x16x32xf32>
    %5 = arith.mulf %1, %4 : vector<1x8x16x32xf32>
    %c0_5 = arith.constant 0 : index
    %c0_6 = arith.constant 0 : index
    %6 = vector.load %arg4[%c0_5, %c0_6] : memref<1x32xf32, #tpu.memory_space<vmem>>, vector<1x32xf32>
    %7 = vector.shape_cast %6 : vector<1x32xf32> to vector<1x1x1x32xf32>
    %8 = vector.broadcast %7 : vector<1x1x1x32xf32> to vector<1x8x16x32xf32>
    %9 = arith.addf %5, %8 : vector<1x8x16x32xf32>
    %c0_7 = arith.constant 0 : index
    %c0_8 = arith.constant 0 : index
    %c0_9 = arith.constant 0 : index
    %c0_10 = arith.constant 0 : index
    %10 = vector.load %arg5[%c0_7, %c0_8, %c0_9, %c0_10] : memref<1x8x16x32xf32, #tpu.memory_space<vmem>>, vector<1x8x16x32xf32>
    tpu.vector_store %arg5[%c0_7, %c0_8, %c0_9, %c0_10], %9 {strides = array<i32>} : memref<1x8x16x32xf32, #tpu.memory_space<vmem>>, vector<1x8x16x32xf32>,
    return
  }
  func.func @transform_0(%arg0: i32, %arg1: i32) -> (i32, i32, i32, i32) {
    %c0_i32 = arith.constant 0 : i32
    %c0_i32_0 = arith.constant 0 : i32
    %c0_i32_1 = arith.constant 0 : i32
    return %arg0, %arg1, %c0_i32, %c0_i32_0 : i32, i32, i32, i32
  }
  func.func @transform_1(%arg0: i32, %arg1: i32) -> (i32, i32) {
    %c0_i32 = arith.constant 0 : i32
    %c0_i32_0 = arith.constant 0 : i32
    %c0_i32_1 = arith.constant 0 : i32
    return %c0_i32, %c0_i32_0 : i32, i32
  }
  func.func @transform_2(%arg0: i32, %arg1: i32) -> (i32, i32) {
    %c0_i32 = arith.constant 0 : i32
    %c0_i32_0 = arith.constant 0 : i32
    %c0_i32_1 = arith.constant 0 : i32
    return %c0_i32, %c0_i32_0 : i32, i32
  }
  func.func @transform_3(%arg0: i32, %arg1: i32) -> (i32, i32, i32, i32) {
    %c0_i32 = arith.constant 0 : i32
    %c0_i32_0 = arith.constant 0 : i32
    %c0_i32_1 = arith.constant 0 : i32
    return %arg0, %arg1, %c0_i32, %c0_i32_0 : i32, i32, i32, i32
  }
}

</mosaic_0001>

<bundles_post_ra>
// kernel: block_forward.5
= control target key start
LH: loop header
LB: loop body
LE: loop exit
PB: predicated region body
PF: predicated region fallthrough
CT: control target
= control target key end

     0   :  { %8 = vsyncpa [#allocation3], 0  ;;  %s861_s0 = inlined_call_operand.vmem [shape: bf16[2,16,16,32], index: 0, kind: input, shape index: {}]   ;;  %s862_s1 = inlined_call_operand.vmem [shape: f32[1,32], index: 1, kind: input, shape index: {}]   ;;  %s863_s2 = inlined_call_operand.vmem [shape: f32[1,32], index: 2, kind: input, shape index: {}]   ;;  %s864_s3 = inlined_call_operand.hbm [shape: f32[2,16,16,32], index: 3, kind: output, shape index: {}]  }
   0x1   :  { %10 = vsyncpa [#allocation3 + $0x1], 0  ;;  %s646_s12 = smov 0   ;;  %s648_s13 = smov 0  }
   0x2   :  { %s650_s14 = smov 0   ;;  %s652_s15 = smov 0  }
   0x3   :  { %s654_s16 = smov 0   ;;  %s656_s17 = smov 0  }
   0x4   :  { %s658_s18 = smov 0   ;;  %s660_s19 = smov 0  }
   0x5 LB: > { %s396_s20 = sadd.s32 4294967295, %s622_s19   ;;  %s397_s21 = sadd.s32 4294967294, %s622_s19   ;;  %s622_s19 = sphi %s660_s19, %s16_s19   ;;  %s618_s18 = sphi %s658_s18, %s873_s18   ;;  %s614_s17 = sphi %s656_s17, %s872_s17   ;;  %s610_s16 = sphi %s654_s16, %s871_s16   ;;  %s606_s15 = sphi %s652_s15, %s870_s15   ;;  %s602_s14 = sphi %s650_s14, %s869_s14   ;;  %s598_s13 = sphi %s648_s13, %s868_s13   ;;  %s594_s12 = sphi %s646_s12, %s867_s12  }
   0x6   : > { %s25_s22 = sadd.s32 1, %s614_s17  ;;  %s28_s23 = sadd.s32 1, %s618_s18 }
   0x7   : > { %p26_p0 = scmp.ge.s32.totalorder %s25_s22, 2  ;;  %p117_p1 = scmp.ne.s32.totalorder %s602_s14, %s598_s13 }
   0x8   : > { %p118_p2 = scmp.eq.s32.totalorder %s396_s20, 3  ;;  %p123_p5 = scmp.ne.s32.totalorder %s598_s13, %s594_s12 }
   0x9   : > { %s875_s22 = smov (%p26_p0, %s25_s22), 0  ;;  %s877_s23 = smov (!%p26_p0, %s28_s23), %s618_s18 }
   0xa   : > { %s103_s24 = ssub.s32 %s614_s17, %s875_s22  ;;  %p697_p3 = por %p118_p2, %p117_p1 }
   0xb   : > { %p30_p4 = scmp.ge.s32.totalorder %s877_s23, 2  ;;  %p124_p6 = scmp.eq.s32.totalorder %s397_s21, 3 }
   0xc   : > { %p400_p7 = scmp.ge.s32.totalorder %s622_s19, 1  ;;  %p162_p9 = scmp.lt.s32.totalorder %s622_s19, 5 }
   0xd   : > { %s879_s23 = smov (%p30_p4, %s877_s23), 0  ;;  %p706_p8 = por %p124_p6, %p123_p5 }
   0xe   : > { %s102_s27 = ssub.s32 %s618_s18, %s879_s23  ;;  %s107_s28 = sadd.s32 1, %s602_s14 }
   0xf   : > { %s104_s29 = sor.u32 %s103_s24, %s102_s27  ;;  %p163_p10 = pnand %p400_p7, %p162_p9 }
  0x10   : > { %p105_p11 = scmp.eq.s32.totalorder %s104_s29, 0  ;;  %s402_s4 = sshll.u32 (!%p163_p10), %s606_s15, 3 }
  0x11   : > { %166 = sbr.rel (%p163_p10) target bundleno = 54 (0x36), region = 32  ;;  %p192_p12 = scmp.lt.s32.totalorder (!%p163_p10), %s610_s16, 1 }
  0x12   : > { %s715_s30 = scalar_select %p105_p11, %s602_s14, %s107_s28  }
  0x13   : > { %p194_p13 = scmp.lt.s32.totalorder (!%p163_p10), %s402_s4, 15  ;;  %s188_s8 = sand.u32 (!%p163_p10), 1, %s598_s13  }
  0x14   : > { %s733_s28 = sshll.u32 (!%p163_p10), %s188_s8, 7  ;;  %s293_s24 = scalar_lea.sflag (!%p163_p10), [#allocation3], %s188_s8 }
  0x16   : > { %s193_s5 = scalar_select %p192_p12, %s610_s16, 1  ;;  %v729_v0 = vld [vmem:[%s862_s1] ss:$0 sm:$0xff]  ;;  %vm275_vm0 = vcmask 261120  }
  0x17   : > { %s881_s4 = smov (!%p194_p13, %s402_s4), 15  ;;  %v741_v5 = vld [vmem:[%s863_s2] ss:$0 sm:$0xff] }
  0x18   : > { %s404_s6 = sshll.u32 %s193_s5, 5  ;;  %s403_s7 = sshll.u32 %s881_s4, 1 }
  0x19   : > { %s198_s9 = sadd.s32 %s404_s6, %s403_s7  ;;  %s413_s5 = sshll.u32 %s606_s15, 4 }
  0x1a   : > { %s405_s10 = sshll.u32 %s198_s9, 2  ;;  %s409_s6 = sshll.u32 %s610_s16, 5 }
  0x1b   : > { %s724_s21 = scalar_lea.vmem %s861_s0, %s405_s10  ;;  %s764_s7 = scalar_lea.vmem [#allocation2], %s733_s28 }
  0x1c   : > { %v415_v1 = vld [vmem:[%s724_s21] sm:$0xff]   ;;  %v446_v2 = vld [vmem:[%s724_s21 + $0x8] sm:$0xff]   ;;  %v447_v3 = vld [vmem:[%s724_s21 + $0x10] sm:$0xff]   ;;  %s305_s15 = sadd.s32 %s413_s5, %s409_s6  ;;  %s308_s20 = sshll.u32 %s764_s7, 4  ;;  %s309_s20 = int_to_ptr.vmem [resolvable:$true] %s308_s20 }
  0x1d   : > { %v416_v4 = vunpack.c.l.bf16 %v415_v1  ;;  %v417_v6 = vunpack.c.h.bf16 %v415_v1  ;;  %v420_v7 = vunpack.c.l.bf16 %v446_v2  ;;  %v421_v8 = vunpack.c.h.bf16 %v446_v2  ;;  %v448_v9 = vld [vmem:[%s724_s21 + $0x18] sm:$0xff]   ;;  %v449_v21 = vld [vmem:[%s724_s21 + $0x20] sm:$0xff]   ;;  %v450_v22 = vld [vmem:[%s724_s21 + $0x28] sm:$0xff]   ;;  %s410_s16 = sshll.u32 %s305_s15, 3  ;;  %s548_s5 = scalar_lea.hbm %s864_s3, 512 }
  0x1e   : > { %v424_v10 = vunpack.c.l.bf16 %v447_v3  ;;  %v425_v11 = vunpack.c.h.bf16 %v447_v3  ;;  %v428_v12 = vunpack.c.l.bf16 %v448_v9  ;;  %v429_v13 = vunpack.c.h.bf16 %v448_v9  ;;  %v451_v26 = vld [vmem:[%s724_s21 + $0x30] sm:$0xff]   ;;  %v452_v30 = vld [vmem:[%s724_s21 + $0x38] sm:$0xff]   ;;  %s307_s11 = scalar_lea.hbm %s864_s3, %s410_s16 }
  0x1f   : > { %v239_v14 = vmul.f32 %v729_v0, %v416_v4  ;;  %v240_v15 = vmul.f32 %v729_v0, %v417_v6  ;;  %v241_v16 = vmul.f32 %v729_v0, %v420_v7  ;;  %v242_v17 = vmul.f32 %v729_v0, %v421_v8  ;;  %s310_s21 = sshll.u32 %s307_s11, 4  ;;  %s311_s21 = int_to_ptr.hbm [resolvable:$true] %s310_s21 }
  0x20   : > { %v243_v18 = vmul.f32 %v729_v0, %v424_v10  ;;  %v244_v19 = vmul.f32 %v729_v0, %v425_v11  ;;  %v245_v20 = vmul.f32 %v729_v0, %v428_v12  ;;  %v246_v29 = vmul.f32 %v729_v0, %v429_v13  ;;  %s542_s27 = sshra.s32 %s311_s21, 4  ;;  %s543_s27 = int_to_ptr.hbm [resolvable:$true] %s542_s27 }
  0x21   : > { %v259_v23 = vadd.f32 %v741_v5, %v239_v14  ;;  %v260_v24 = vadd.f32 %v741_v5, %v240_v15  ;;  %v261_v25 = vadd.f32 %v741_v5, %v241_v16  ;;  %v262_v27 = vadd.f32 %v741_v5, %v242_v17  ;;  %s544_s28 = scalar_lea.hbm %s543_s27, 128  ;;  %p549_p4 = scmp.lt.s32.totalorder %s543_s27, %s864_s3 }
  0x22   : > { %v263_v28 = vadd.f32 %v741_v5, %v243_v18  ;;  %v432_v31 = vunpack.c.l.bf16 %v449_v21  ;;  %v433_v32 = vunpack.c.h.bf16 %v449_v21  ;;  %v436_v33 = vunpack.c.l.bf16 %v450_v22  ;;  %p545_p0 = scmp.ne.s32.totalorder %s543_s27, %s544_s28  ;;  %p550_p5 = scmp.lt.s32.totalorder %s548_s5, %s544_s28 }
  0x23   : > { %276 = vst.msk [vmem:[%s764_s7] sm:$0xff] %vm275_vm0, %v259_v23  ;;  %v437_v34 = vunpack.c.h.bf16 %v450_v22  ;;  %v264_v35 = vadd.f32 %v741_v5, %v244_v19  ;;  %v265_v36 = vadd.f32 %v741_v5, %v245_v20  ;;  %v440_v37 = vunpack.c.l.bf16 %v451_v26 }
  0x24   : > { %277 = vst.msk [vmem:[%s764_s7 + $0x8] sm:$0xff] %vm275_vm0, %v260_v24  ;;  %v441_v38 = vunpack.c.h.bf16 %v451_v26  ;;  %v247_v39 = vmul.f32 %v729_v0, %v432_v31  ;;  %v248_v40 = vmul.f32 %v729_v0, %v433_v32  ;;  %v249_v41 = vmul.f32 %v729_v0, %v436_v33  ;;  %p546_p1 = pnand %p545_p0, %p697_p3  ;;  %p551_p6 = por %p550_p5, %p549_p4 }
  0x25   : > { %278 = vst.msk [vmem:[%s764_s7 + $0x10] sm:$0xff] %vm275_vm0, %v261_v25  ;;  %v444_v42 = vunpack.c.l.bf16 %v452_v30  ;;  %v266_v43 = vadd.f32 %v741_v5, %v246_v29  ;;  %v250_v44 = vmul.f32 %v729_v0, %v437_v34  ;;  %v445_v45 = vunpack.c.h.bf16 %v452_v30 }
  0x26   : > { %279 = vst.msk [vmem:[%s764_s7 + $0x18] sm:$0xff] %vm275_vm0, %v262_v27  ;;  %v267_v46 = vadd.f32 %v741_v5, %v247_v39  ;;  %v251_v47 = vmul.f32 %v729_v0, %v440_v37  ;;  %v268_v48 = vadd.f32 %v741_v5, %v248_v40  ;;  %v252_v49 = vmul.f32 %v729_v0, %v441_v38  ;;  %p547_p2 = pneg %p546_p1 }
  0x27   : > { %280 = vst.msk [vmem:[%s764_s7 + $0x20] sm:$0xff] %vm275_vm0, %v263_v28  ;;  %v269_v50 = vadd.f32 %v741_v5, %v249_v41  ;;  %v253_v51 = vmul.f32 %v729_v0, %v444_v42  ;;  %v270_v52 = vadd.f32 %v741_v5, %v250_v44  ;;  %v254_v53 = vmul.f32 %v729_v0, %v445_v45 }
  0x28   : > { %281 = vst.msk [vmem:[%s764_s7 + $0x28] sm:$0xff] %vm275_vm0, %v264_v35  ;;  %v271_v54 = vadd.f32 %v741_v5, %v251_v47  ;;  %v272_v55 = vadd.f32 %v741_v5, %v252_v49  ;;  %p552_p7 = pnand %p551_p6, %p547_p2 }
  0x29   : > { %282 = vst.msk [vmem:[%s764_s7 + $0x30] sm:$0xff] %vm275_vm0, %v265_v36  ;;  %v273_v56 = vadd.f32 %v741_v5, %v253_v51  ;;  %v274_v57 = vadd.f32 %v741_v5, %v254_v53 }
  0x2a   : > { %283 = vst.msk [vmem:[%s764_s7 + $0x38] sm:$0xff] %vm275_vm0, %v266_v43 }
  0x2b   : > { %284 = vst.msk [vmem:[%s764_s7 + $0x40] sm:$0xff] %vm275_vm0, %v267_v46 }
  0x2c   : > { %285 = vst.msk [vmem:[%s764_s7 + $0x48] sm:$0xff] %vm275_vm0, %v268_v48 }
  0x2d   : > { %286 = vst.msk [vmem:[%s764_s7 + $0x50] sm:$0xff] %vm275_vm0, %v269_v50 }
  0x2e   : > { %287 = vst.msk [vmem:[%s764_s7 + $0x58] sm:$0xff] %vm275_vm0, %v270_v52 }
  0x2f   : > { %288 = vst.msk [vmem:[%s764_s7 + $0x60] sm:$0xff] %vm275_vm0, %v271_v54 }
  0x30   : > { %289 = vst.msk [vmem:[%s764_s7 + $0x68] sm:$0xff] %vm275_vm0, %v272_v55 }
  0x31   : > { %290 = vst.msk [vmem:[%s764_s7 + $0x70] sm:$0xff] %vm275_vm0, %v273_v56 }
  0x32   : > { %291 = vst.msk [vmem:[%s764_s7 + $0x78] sm:$0xff] %vm275_vm0, %v274_v57 }
  0x33   : > { %555 = shalt.err (!%p552_p7)
}
  0x34   : > { %s624_s8 = smov 128   ;;  %s625_s7 = smov 8  }
  0x35   : > { %453 = dma.vmem_to_hbm [thread:$0]  (%p697_p3), %s309_s20, 2048, %s311_s21, %s293_s24, %s624_s8, %s624_s8, %s625_s7  }
  0x36 PF: > { %p459_p9 = scmp.ge.s32.totalorder %s622_s19, 2  ;;  %s325_s16 = sand.u32 1, %s594_s12  }
  0x37   : > { %s326_s9 = scalar_lea.sflag [#allocation3], %s325_s16 }
  0x38   : > { %p456_p10 = pnand %p459_p9, %p706_p8 }
  0x3a   : > { %p457_p11 = pneg %p456_p10 }
  0x3c   : > { %589 = dma.done.wait (%p457_p11), %s326_s9, 2048  }
  0x3d   : > { %591 = vsyncadd (%p457_p11), %s326_s9, 4294965248  ;;  %s16_s19 = sadd.s32 1, %s622_s19   ;;  %s867_s12 = smov %s598_s13 }
  0x3e   : > { %p13_p12 = scmp.ge.s32.totalorder %s16_s19, 6   ;;  %s868_s13 = smov %s602_s14 }
  0x3f   : > { %s869_s14 = smov %s715_s30  ;;  %s870_s15 = smov %s614_s17 }
  0x40   : > { %s871_s16 = smov %s618_s18  ;;  %s872_s17 = smov %s875_s22 }
  0x41   : > { %s873_s18 = smov %s879_s23  ;;  %15 = sbr.rel (!%p13_p12) target bundleno = 5 (0x5), region = 67 }
  0x46   :  { %332 = vsyncpa [#allocation3], 1 }
  0x47   :  { %334 = vsyncpa [#allocation3 + $0x1], 1 }

// kernel: block_forward.3
= control target key start
LH: loop header
LB: loop body
LE: loop exit
PB: predicated region body
PF: predicated region fallthrough
CT: control target
= control target key end

     0   :  { %s1807_s21 = smov 0   ;;  %s1809_s22 = smov 0   ;;  %s2427_s0 = inlined_call_operand.vmem [shape: f32[2,16,16,4], index: 0, kind: input, shape index: {}, may-alias: {0,1,2}]   ;;  %s2428_s1 = inlined_call_operand.vmem [shape: f32[2,16,16,4], index: 1, kind: input, shape index: {}, may-alias: {0,1,2}]   ;;  %s2429_s2 = inlined_call_operand.vmem [shape: f32[2,16,16,4], index: 2, kind: input, shape index: {}, may-alias: {0,1,2}]   ;;  %s2430_s3 = inlined_call_operand.vmem [shape: bf16[36,32], index: 3, kind: input, shape index: {}]   ;;  %s2431_s4 = inlined_call_operand.vmem [shape: f32[1,32], index: 4, kind: input, shape index: {}]   ;;  %s2432_s5 = inlined_call_operand.vmem [shape: bf16[2,16,16,32], index: 5, kind: output, shape index: {0}]   ;;  %s2433_s6 = inlined_call_operand.vmem [shape: f32[2,2,2,32], index: 6, kind: output, shape index: {1}]  }
   0x1   :  { %s1811_s23 = smov 0   ;;  %s1813_s24 = smov 0  }
   0x2   :  { %s1815_s25 = smov 0  }
   0x3 LB: > { %s26_s26 = sadd.s32 1, %s1754_s23  ;;  %s29_s27 = sadd.s32 1, %s1758_s24  ;;  %s1762_s25 = sphi %s1815_s25, %s17_s25   ;;  %s1758_s24 = sphi %s1813_s24, %s2439_s24   ;;  %s1754_s23 = sphi %s1811_s23, %s2438_s23   ;;  %s1750_s22 = sphi %s1809_s22, %s2437_s22   ;;  %s1746_s21 = sphi %s1807_s21, %s2436_s21  }
   0x4   : > { %p27_p0 = scmp.ge.s32.totalorder %s26_s26, 2  ;;  %p1626_p1 = scmp.ge.s32.totalorder %s1762_s25, 1 }
   0x5   : > { %p303_p2 = scmp.lt.s32.totalorder %s1762_s25, 5 }
   0x6   : > { %s2441_s26 = smov (%p27_p0, %s26_s26), 0  ;;  %s2443_s27 = smov (!%p27_p0, %s29_s27), %s1758_s24 }
   0x7   : > { %p304_p3 = pnand %p1626_p1, %p303_p2  ;;  %p31_p4 = scmp.ge.s32.totalorder %s2443_s27, 2 }
   0x8   : > { %s1840_s28 = sshll.u32 (!%p304_p3), %s1746_s21, 3  ;;  %p381_p5 = scmp.lt.s32.totalorder (!%p304_p3), %s1750_s22, 1 }
   0x9   : > { %s2445_s27 = smov (%p31_p4, %s2443_s27), 0  ;;  %307 = sbr.rel (%p304_p3) target bundleno = 486 (0x1e6), region = 40 }
   0xa   : > { %p397_p6 = scmp.lt.s32.totalorder (!%p304_p3), %s1840_s28, 15  ;;  %s1628_s13 = sadd.s32 (!%p304_p3), 4294967295, %s1840_s28 }
   0xb   : > { %p379_p7 = scmp.lt.s32.totalorder (!%p304_p3), %s1628_s13, 0  ;;  %s1764_s20 = smov (!%p304_p3), 12  }
   0xc   : > { %s406_s10 = sadd.s32 (!%p304_p3), 8, %s1840_s28  ;;  %s1768_s11 = smov (!%p304_p3), 28  }
   0xd   : > { %p407_p9 = scmp.gt.s32.totalorder (!%p304_p3), %s406_s10, 15  ;;  %p435_p11 = scmp.lt.s32.totalorder (!%p304_p3), %s1746_s21, 1 }
   0xe   : > { %s2447_s22 = smov (!%p381_p5, %s1750_s22), 1  ;;  %vm732_vm0 = vcmask 1040384   ;;  %vm733_vm1 = vsmask.f32 256  ;;  %s2449_s13 = smov (%p379_p7, %s1628_s13), 1  ;;  %vm884_vm3 = vcmask 1046528  }
   0xf   : > { %s398_s29 = scalar_select %p397_p6, %s1840_s28, 15  ;;  %vm1872_vm2 = vmand %vm732_vm0, %vm733_vm1  ;;  %vm755_vm4 = vsmask.f32 7424  ;;  %vm1232_vm5 = vcmask 1041408   ;;  %vm1055_vm6 = vcmask 31744   ;;  %vm1072_vm7 = vcmask 64512  }
  0x10   : > { %s1847_s30 = sshll.u32 %s2447_s22, 5  ;;  %p383_p8 = scmp.lt.s32.totalorder %s2449_s13, 15  ;;  %vm1089_vm8 = vcmask 97280   ;;  %vm1123_vm9 = vcmask 162816   ;;  %vm1106_vm10 = vcmask 130048   ;;  %vm1140_vm11 = vcmask 195584  }
  0x11   : > { %s1633_s7 = sshll.u32 %s398_s29, 1  ;;  %s1765_s29 = smov 24   ;;  %vm1157_vm12 = vcmask 228352   ;;  %vm1174_vm13 = vcmask 261120   ;;  %vm1215_vm14 = vcmask 293888   ;;  %vm1317_vm15 = vcmask 257024  }
  0x12   : > { %s1850_s8 = sadd.s32 %s1633_s7, %s1847_s30  ;;  %s2451_s13 = smov (!%p383_p8, %s2449_s13), 15  ;;  %vm1426_vm1 = vcmask 254976  }
  0x13   : > { %s1635_s9 = sshll.u32 %s1850_s8, 3  ;;  %s1629_s14 = sshll.u32 %s2451_s13, 1 }
  0x14   : > { %s1856_s12 = scalar_lea.vmem %s2428_s1, %s1635_s9  ;;  %s387_s15 = sadd.s32 %s1847_s30, %s1629_s14 }
  0x15   : > { %v446_v0 = vld [vmem:[%s1856_s12] sm:$0xff]  ;;  %v447_v1 = vld [vmem:[%s1856_s12 + $0x8] sm:$0xff]  ;;  %v448_v2 = vld [vmem:[%s1856_s12 + $0x10] sm:$0xff]  ;;  %s1631_s16 = sshll.u32 %s387_s15, 3  ;;  %s1766_s7 = smov 8  }
  0x16   : > { %v462_v3 = vpack.c.bf16 %v446_v0, %v446_v0  ;;  %v463_v4 = vpack.c.bf16 %v447_v1, %v447_v1  ;;  %v449_v5 = vld [vmem:[%s1856_s12 + $0x18] sm:$0xff]  ;;  %v464_v6 = vpack.c.bf16 %v448_v2, %v448_v2  ;;  %v450_v7 = vld [vmem:[%s1856_s12 + $0x20] sm:$0xff]  ;;  %v451_v8 = vld [vmem:[%s1856_s12 + $0x28] sm:$0xff]  ;;  %s389_s19 = scalar_lea.vmem %s2427_s0, %s1631_s16  ;;  %s1767_s9 = smov 32  }
  0x17   : > { %v465_v9 = vpack.c.bf16 %v449_v5, %v449_v5  ;;  %v466_v10 = vpack.c.bf16 %v450_v7, %v450_v7  ;;  %v467_v11 = vpack.c.bf16 %v451_v8, %v451_v8  ;;  %v452_v12 = vld [vmem:[%s1856_s12 + $0x30] sm:$0xff]  ;;  %v453_v16 = vld [vmem:[%s1856_s12 + $0x38] sm:$0xff]  ;;  %v442_v59 = vld [vmem:[%s389_s19] sm:$0xff]  ;;  %s2453_s10 = smov (%p407_p9, %s406_s10), 14  ;;  %s1769_s28 = smov 16  }
  0x18   : > { %v493_v13 = vunpack.c.l.b16 %v462_v3  ;;  %v563_v14 = vunpack.c.l.b16 %v463_v4  ;;  %v494_v15 = vunpack.c.l.b16 %v464_v6  ;;  %v468_v20 = vpack.c.bf16 %v452_v12, %v452_v12  ;;  %v443_v0 = vld [vmem:[%s389_s19 + $0x8] sm:$0xff]  ;;  %p411_p10 = scmp.lt.s32.totalorder %s2453_s10, 15  ;;  %s1770_s13 = smov 20  }
  0x19   : > { %v564_v17 = vunpack.c.l.b16 %v465_v9  ;;  %v495_v18 = vunpack.c.l.b16 %v466_v10  ;;  %v1867_v19 = vunpack.c.l.b16 %v467_v11  ;;  %v469_v28 = vpack.c.bf16 %v453_v16, %v453_v16  ;;  %s1771_s16 = smov 4   ;;  %s2457_s21 = smov (!%p435_p11, %s1746_s21), 1 }
  0x1a   : > { %v503_v21 = vpack.c.b16 %v493_v13, %v493_v13  ;;  %v573_v22 = vpack.c.b16 %v563_v14, %v493_v13  ;;  %v504_v23 = vpack.c.b16 %v494_v15, %v494_v15  ;;  %v673_v24 = vpack.c.b16 %v563_v14, %v563_v14  ;;  %s2455_s10 = smov (!%p411_p10, %s2453_s10), 15 }
  0x1b   : > { %v574_v25 = vpack.c.b16 %v564_v17, %v494_v15  ;;  %v674_v26 = vpack.c.b16 %v564_v17, %v564_v17  ;;  %v575_v27 = vpack.c.b16 %v1867_v19, %v495_v18  ;;  %v505_v32 = vpack.c.b16 %v495_v18, %v495_v18  ;;  %s1637_s14 = sshll.u32 %s2455_s10, 1 }
  0x1c   : > { %v516_v29 = vshrl.u32 %v503_v21, 16  ;;  %v590_v30 = vshrl.u32 %v573_v22, 16  ;;  %v593_v31 = vshll.u32 %v573_v22, 16  ;;  %v519_v33 = vshrl.u32 %v504_v23, 16  ;;  %s1976_s15 = sadd.s32 %s1637_s14, %s1847_s30 }
  0x1d   : > { %v597_v34 = vshrl.u32 %v574_v25, 16  ;;  %v600_v35 = vshll.u32 %v574_v25, 16  ;;  %v691_v36 = vshll.u32 %v674_v26, 16  ;;  %v604_v39 = vshrl.u32 %v575_v27, 16  ;;  %s1639_s17 = sshll.u32 %s1976_s15, 3 }
  0x1e   : > { %v592_v37 = vrot.slane %v590_v30, 7  ;;  %v607_v40 = vshll.u32 %v575_v27, 16  ;;  %v687_v41 = vshll.u32 %v673_v24, 16  ;;  %v496_v44 = vunpack.c.l.b16 %v468_v20  ;;  %s417_s10 = scalar_lea.vmem %s2429_s2, %s1639_s17 }
  0x1f   : > { %v599_v42 = vrot.slane %v597_v34, 7  ;;  %v693_v43 = vrot.slane %v691_v36, 3  ;;  %v566_v45 = vunpack.c.l.b16 %v469_v28  ;;  %v1877_v47 = vrot.slane %v604_v39, 7  ;;  %v454_v39 = vld [vmem:[%s1856_s12 + $0x40] sm:$0xff] }
  0x20   : > { %v595_v46 = vor.u32 %v593_v31, %v592_v37  ;;  %v689_v48 = vrot.slane %v687_v41, 3  ;;  %v522_v53 = vshrl.u32 %v505_v32, 16  ;;  %v506_v3 = vpack.c.b16 %v496_v44, %v496_v44 }
  0x21   : > { %v602_v49 = vor.u32 %v600_v35, %v599_v42  ;;  %v747_v50 = vsel %vm1872_vm2, %v599_v42, %v693_v43  ;;  %v576_v54 = vpack.c.b16 %v566_v45, %v496_v44  ;;  %v609_v56 = vor.u32 %v607_v40, %v1877_v47 }
  0x22   : > { %v1886_v51 = vsel %vm1872_vm2, %v516_v29, %v595_v46  ;;  %v892_v52 = vrot.slane %v747_v50, 1  ;;  %v1897_v57 = vsel %vm1872_vm2, %v592_v37, %v689_v48  ;;  %v788_v63 = vshll.u32 %v747_v50, 16 }
  0x23   : > { %926 = vrot.lane.b32.xlu1 %v1886_v51, %s1764_s20  ;;  %v1892_v55 = vsel %vm1872_vm2, %v519_v33, %v602_v49  ;;  %v771_v58 = vshll.u32 %v1886_v51, 16  ;;  %v769_v1 = vshrl.u32 %v1886_v51, 16  ;;  %v675_v4 = vpack.c.b16 %v1867_v19, %v1867_v19  ;;  %v455_v49 = vld [vmem:[%s1856_s12 + $0x48] sm:$0xff] }
  0x24   : > { %991 = vrot.lane.b32.xlu2 %v1892_v55, %s1765_s29  ;;  %v891_v60 = vrot.slane %v1892_v55, 1  ;;  %v781_v61 = vshrl.u32 %v1892_v55, 16  ;;  %v783_v62 = vshll.u32 %v1892_v55, 16  ;;  %v776_v7 = vshll.u32 %v1897_v57, 16 }
  0x25   : > { %v773_v2 = vrot.slane %v771_v58, 1  ;;  %v444_v8 = vpack.c.bf16 %v442_v59, %v442_v59  ;;  %v1916_v9 = vsel %vm1872_vm2, %v522_v53, %v609_v56  ;;  %v445_v10 = vpack.c.bf16 %v443_v0, %v443_v0 }
  0x26   : > { %v1909_v5 = vsel %vm884_vm3, %v891_v60, %v892_v52  ;;  %v785_v6 = vrot.slane %v783_v62, 1  ;;  %v790_v12 = vrot.slane %v788_v63, 1  ;;  %v611_v14 = vshrl.u32 %v576_v54, 16 }
  0x27   : > { %913 = vrot.lane.b32.xlu0 %v1909_v5, %s1766_s7  ;;  %v492_v13 = vunpack.c.l.b16 %v444_v8  ;;  %v774_v15 = vor.u32 %v773_v2, %v769_v1  ;;  %v562_v16 = vunpack.c.l.b16 %v445_v10  ;;  %v614_v17 = vshll.u32 %v576_v54, 16 }
  0x28   : > { %v786_v11 = vor.u32 %v785_v6, %v781_v61  ;;  %v676_v18 = vpack.c.b16 %v566_v45, %v566_v45  ;;  %v778_v19 = vrot.slane %v776_v7, 1  ;;  %v525_v20 = vshrl.u32 %v506_v3, 16  ;;  %v457_v6 = vld [vmem:[%s1856_s12 + $0x58] sm:$0xff] }
  0x29   : > { %v613_v21 = vrot.slane %v611_v14, 7  ;;  %v695_v22 = vshll.u32 %v675_v4, 16  ;;  %v502_v23 = vpack.c.b16 %v492_v13, %v492_v13  ;;  %v572_v24 = vpack.c.b16 %v562_v16, %v492_v13  ;;  %v456_v4 = vld [vmem:[%s1856_s12 + $0x50] sm:$0xff] }
  0x2a   : > { %v672_v25 = vpack.c.b16 %v562_v16, %v562_v16  ;;  %v699_v26 = vshll.u32 %v676_v18, 16  ;;  %v1923_v27 = vsel %vm755_vm4, %v786_v11, %v790_v12  ;;  %v888_v28 = vrot.slane %v1886_v51, 1 }
  0x2b   : > { %1039 = vrot.lane.b32.xlu1 %v1909_v5, %s1767_s9  ;;  %v889_v29 = vrot.slane %v1897_v57, 1  ;;  %v616_v30 = vor.u32 %v614_v17, %v613_v21  ;;  %v583_v31 = vshrl.u32 %v572_v24, 16  ;;  %v586_v32 = vshll.u32 %v572_v24, 16 }
  0x2c   : > { %930 = vrot.lane.b32.xlu2 %v1916_v9, %s1764_s20  ;;  %v683_v33 = vshll.u32 %v672_v25, 16  ;;  %v701_v34 = vrot.slane %v699_v26, 3  ;;  %v1929_v35 = vsel %vm755_vm4, %v774_v15, %v778_v19  ;;  %v697_v37 = vrot.slane %v695_v22, 3 }
  0x2d   : > { %v1933_v36 = vsel %vm1872_vm2, %v525_v20, %v616_v30  ;;  %v513_v40 = vshrl.u32 %v502_v23, 16  ;;  %v585_v41 = vrot.slane %v583_v31, 7  ;;  %v795_v48 = vshll.u32 %v1916_v9, 16 }
  0x2e   : > { %v685_v42 = vrot.slane %v683_v33, 3  ;;  %v1940_v43 = vsel %vm1872_vm2, %v613_v21, %v701_v34  ;;  %v805_v44 = vshrl.u32 %v1933_v36, 16  ;;  %v807_v45 = vshll.u32 %v1933_v36, 16 }
  0x2f   : > { %1019 = vrot.lane.b32.xlu0 %v1923_v27, %s1768_s11  ;;  %v812_v46 = vshll.u32 %v1940_v43, 16  ;;  %v1948_v50 = vsel %vm884_vm3, %v888_v28, %v889_v29  ;;  %v588_v52 = vor.u32 %v586_v32, %v585_v41  ;;  %v470_v54 = vpack.c.bf16 %v454_v39, %v454_v39 }
  0x30   : > { %v745_v53 = vsel %vm1872_vm2, %v585_v41, %v685_v42  ;;  %v809_v57 = vrot.slane %v807_v45, 1  ;;  %v1955_v58 = vsel %vm1872_vm2, %v1877_v47, %v697_v37  ;;  %v793_v60 = vshrl.u32 %v1916_v9, 16 }
  0x31   : > { %v886_v56 = vrot.slane %v745_v53, 1  ;;  %v1961_v59 = vsel %vm1872_vm2, %v513_v40, %v588_v52  ;;  %v471_v61 = vpack.c.bf16 %v455_v49, %v455_v49  ;;  %v814_v63 = vrot.slane %v812_v46, 1 }
  0x32   : > { %v885_v47 = vrot.slane %v1961_v59, 1  ;;  %v810_v62 = vor.u32 %v809_v57, %v805_v44  ;;  %v797_v0 = vrot.slane %v795_v48, 1  ;;  %v800_v1 = vshll.u32 %v1955_v58, 16 }
  0x33   : > { %954 = vrot.lane.b32.xlu1 %v1929_v35, %s1769_s28  ;;  %v497_v2 = vunpack.c.l.b16 %v470_v54  ;;  %v567_v3 = vunpack.c.l.b16 %v471_v61  ;;  %v897_v8 = vrot.slane %v1933_v36, 1  ;;  %v898_v10 = vrot.slane %v1940_v43, 1 }
  0x34   : > { %974 = vrot.lane.b32.xlu2 %v1948_v50, %s1770_s13  ;;  %v887_v7 = vsel %vm884_vm3, %v885_v47, %v886_v56  ;;  %v759_v11 = vshll.u32 %v1961_v59, 16  ;;  %v1979_v15 = vsel %vm755_vm4, %v810_v62, %v814_v63  ;;  %v798_v16 = vor.u32 %v797_v0, %v793_v60 }
  0x35   : > { %v507_v12 = vpack.c.b16 %v497_v2, %v497_v2  ;;  %v577_v13 = vpack.c.b16 %v567_v3, %v497_v2  ;;  %v677_v14 = vpack.c.b16 %v567_v3, %v567_v3  ;;  %v472_v17 = vpack.c.bf16 %v456_v4, %v456_v4 }
  0x36   : > { %v473_v18 = vpack.c.bf16 %v457_v6, %v457_v6  ;;  %v802_v19 = vrot.slane %v800_v1, 1  ;;  %v757_v23 = vshrl.u32 %v1961_v59, 16  ;;  %v764_v24 = vshll.u32 %v745_v53, 16  ;;  %v458_v6 = vld [vmem:[%s1856_s12 + $0x60] sm:$0xff] }
  0x37   : > { %909 = vrot.lane.b32.xlu0 %v887_v7, %s1766_s7  ;;  %v618_v20 = vshrl.u32 %v577_v13, 16  ;;  %v621_v21 = vshll.u32 %v577_v13, 16  ;;  %v703_v22 = vshll.u32 %v677_v14, 16  ;;  %v498_v25 = vunpack.c.l.b16 %v472_v17  ;;  %v459_v7 = vld [vmem:[%s1856_s12 + $0x68] sm:$0xff] }
  0x38   : > { %v568_v26 = vunpack.c.l.b16 %v473_v18  ;;  %v761_v28 = vrot.slane %v759_v11, 1  ;;  %v528_v29 = vshrl.u32 %v507_v12, 16  ;;  %v1987_v32 = vsel %vm884_vm3, %v897_v8, %v898_v10 }
  0x39   : > { %v620_v30 = vrot.slane %v618_v20, 7  ;;  %v705_v31 = vrot.slane %v703_v22, 3  ;;  %v1994_v39 = vsel %vm755_vm4, %v798_v16, %v802_v19  ;;  %v766_v41 = vrot.slane %v764_v24, 1 }
  0x3a   : > { %v578_v33 = vpack.c.b16 %v568_v26, %v498_v25  ;;  %v762_v40 = vor.u32 %v761_v28, %v757_v23  ;;  %v508_v52 = vpack.c.b16 %v498_v25, %v498_v25  ;;  %v678_v53 = vpack.c.b16 %v568_v26, %v568_v26 }
  0x3b   : > { %860 = vrot.lane.b32.xlu1 %v1979_v15, %s1771_s16  ;;  %v623_v34 = vor.u32 %v621_v21, %v620_v30  ;;  %v750_v37 = vsel %vm1872_vm2, %v620_v30, %v705_v31  ;;  %v894_v61 = vrot.slane %v1916_v9, 1  ;;  %v895_v47 = vrot.slane %v1955_v58, 1 }
  0x3c   : > { %856 = vrot.lane.b32.xlu2 %v1923_v27, %s1771_s16  ;;  %v824_v45 = vshll.u32 %v750_v37, 16  ;;  %v625_v46 = vshrl.u32 %v578_v33, 16  ;;  %v767_v49 = vsel %vm755_vm4, %v762_v40, %v766_v41  ;;  %v628_v60 = vshll.u32 %v578_v33, 16  ;;  %v460_v40 = vld [vmem:[%s1856_s12 + $0x70] sm:$0xff] }
  0x3d   : > { %v1998_v42 = vsel %vm1872_vm2, %v528_v29, %v623_v34  ;;  %v531_v63 = vshrl.u32 %v508_v52, 16  ;;  %v707_v1 = vshll.u32 %v678_v53, 16  ;;  %v2016_v2 = vsel %vm884_vm3, %v894_v61, %v895_v47 }
  0x3e   : > { %v817_v43 = vshrl.u32 %v1998_v42, 16  ;;  %v819_v44 = vshll.u32 %v1998_v42, 16  ;;  %v826_v56 = vrot.slane %v824_v45, 1  ;;  %v627_v57 = vrot.slane %v625_v46, 7 }
  0x3f   : > { %917 = vrot.lane.b32.xlu0 %v1987_v32, %s1766_s7  ;;  %v709_v3 = vrot.slane %v707_v1, 3  ;;  %v901_v8 = vrot.slane %v750_v37, 1  ;;  %v900_v10 = vrot.slane %v1998_v42, 1  ;;  %v474_v12 = vpack.c.bf16 %v458_v6, %v458_v6 }
  0x40   : > { %v821_v48 = vrot.slane %v819_v44, 1  ;;  %v630_v0 = vor.u32 %v628_v60, %v627_v57  ;;  %v475_v13 = vpack.c.bf16 %v459_v7, %v459_v7  ;;  %v476_v44 = vpack.c.bf16 %v460_v40, %v460_v40 }
  0x41   : > { %v751_v11 = vsel %vm1872_vm2, %v627_v57, %v709_v3  ;;  %v2036_v18 = vsel %vm884_vm3, %v900_v10, %v901_v8  ;;  %v499_v19 = vunpack.c.l.b16 %v474_v12 }
  0x42   : > { %v822_v54 = vor.u32 %v821_v48, %v817_v43  ;;  %v2022_v4 = vsel %vm1872_vm2, %v531_v63, %v630_v0  ;;  %v836_v17 = vshll.u32 %v751_v11, 16  ;;  %v569_v20 = vunpack.c.l.b16 %v475_v13 }
  0x43   : > { %958 = vrot.lane.b32.xlu1 %v1994_v39, %s1769_s28  ;;  %v831_v58 = vshll.u32 %v2022_v4, 16  ;;  %v829_v14 = vshrl.u32 %v2022_v4, 16  ;;  %v903_v25 = vrot.slane %v2022_v4, 1  ;;  %v904_v26 = vrot.slane %v751_v11, 1 }
  0x44   : > { %934 = vrot.lane.b32.xlu2 %v1998_v42, %s1764_s20  ;;  %v2011_v62 = vsel %vm755_vm4, %v822_v54, %v826_v56  ;;  %v838_v22 = vrot.slane %v836_v17, 1  ;;  %v579_v23 = vpack.c.b16 %v569_v20, %v499_v19  ;;  %v679_v29 = vpack.c.b16 %v569_v20, %v569_v20 }
  0x45   : > { %v833_v16 = vrot.slane %v831_v58, 1  ;;  %v2053_v30 = vsel %vm884_vm3, %v903_v25, %v904_v26  ;;  %v509_v31 = vpack.c.b16 %v499_v19, %v499_v19 }
  0x46   : > { %v632_v28 = vshrl.u32 %v579_v23, 16  ;;  %v635_v34 = vshll.u32 %v579_v23, 16  ;;  %v711_v37 = vshll.u32 %v679_v29, 16 }
  0x47   : > { %852 = vrot.lane.b32.xlu0 %v767_v49, %s1771_s16  ;;  %v834_v21 = vor.u32 %v833_v16, %v829_v14  ;;  %v534_v41 = vshrl.u32 %v509_v31, 16  ;;  %v500_v49 = vunpack.c.l.b16 %v476_v44  ;;  %v478_v44 = vld [vmem:[%s417_s10] sm:$0xff] }
  0x48   : > { %v634_v33 = vrot.slane %v632_v28, 7  ;;  %v713_v46 = vrot.slane %v711_v37, 3 }
  0x49   : > { %v2043_v24 = vsel %vm755_vm4, %v834_v21, %v838_v22 }
  0x4a   : > { %v637_v43 = vor.u32 %v635_v34, %v634_v33  ;;  %v752_v54 = vsel %vm1872_vm2, %v634_v33, %v713_v46  ;;  %v1195_v33 = vld [vmem:[%s2430_s3 + $0x10] sm:$0x3] }
  0x4b   : > { %962 = vrot.lane.b32.xlu1 %v2011_v62, %s1769_s28  ;;  %v848_v60 = vshll.u32 %v752_v54, 16  ;;  %v907_v3 = vrot.slane %v752_v54, 1  ;;  %v1209_v34 = vunpack.c.l.b16 %v1195_v33 }
  0x4c   : > { %995 = vrot.lane.b32.xlu2 %v1933_v36, %s1765_s29  ;;  %v2065_v48 = vsel %vm1872_vm2, %v534_v41, %v637_v43  ;;  %v1665_v43 = vld [vmem:[%s2430_s3 + $0x8] sm:$0xff] }
  0x4d   : > { %v843_v53 = vshll.u32 %v2065_v48, 16  ;;  %v841_v56 = vshrl.u32 %v2065_v48, 16  ;;  %v850_v47 = vrot.slane %v848_v60, 1  ;;  %v906_v1 = vrot.slane %v2065_v48, 1 }
  0x4f   : > { %978 = vrot.lane.b32.xlu0 %v2016_v2, %s1770_s13  ;;  %v845_v57 = vrot.slane %v843_v53, 1  ;;  %v2088_v8 = vsel %vm884_vm3, %v906_v1, %v907_v3 }
  0x51   : > { %v846_v61 = vor.u32 %v845_v57, %v841_v56 }
  0x53   : > { %1023 = vrot.lane.b32.xlu1 %v1979_v15, %s1768_s11  ;;  %v2078_v0 = vsel %vm755_vm4, %v846_v61, %v850_v47 }
  0x54   : > { %999 = vrot.lane.b32.xlu2 %v2022_v4, %s1765_s29 }
  0x57   : > { %982 = vrot.lane.b32.xlu0 %v2036_v18, %s1770_s13 }
  0x5b   : > { %854 = vrot.lane.b32.xlu1 %v1929_v35, %s1771_s16  ;;  %v461_v35 = vld [vmem:[%s1856_s12 + $0x78] sm:$0xff] }
  0x5c   : > { %1027 = vrot.lane.b32.xlu2 %v2043_v24, %s1768_s11  ;;  %v477_v45 = vpack.c.bf16 %v461_v35, %v461_v35 }
  0x5e   : > { %v570_v52 = vunpack.c.l.b16 %v477_v45  ;;  %v479_v45 = vld [vmem:[%s417_s10 + $0x8] sm:$0xff] }
  0x5f   : > { %1043 = vrot.lane.b32.xlu0 %v1987_v32, %s1767_s9  ;;  %v481_v53 = vpack.c.bf16 %v479_v45, %v479_v45 }
  0x60   : > { %v680_v7 = vpack.c.b16 %v570_v52, %v570_v52 }
  0x61   : > { %v571_v57 = vunpack.c.l.b16 %v481_v53 }
  0x62   : > { %v715_v12 = vshll.u32 %v680_v7, 16 }
  0x63   : > { %1047 = vrot.lane.b32.xlu1 %v2053_v30, %s1767_s9 }
  0x64   : > { %864 = vrot.lane.b32.xlu2 %v2043_v24, %s1771_s16  ;;  %v717_v13 = vrot.slane %v715_v12, 3 }
  0x67   : > { %911 = vrot.lane.b32.xlu0 %v1948_v50, %s1766_s7  ;;  %v580_v50 = vpack.c.b16 %v570_v52, %v500_v49  ;;  %v480_v52 = vpack.c.bf16 %v478_v44, %v478_v44 }
  0x69   : > { %v639_v63 = vshrl.u32 %v580_v50, 16  ;;  %v642_v6 = vshll.u32 %v580_v50, 16 }
  0x6b   : > { %921 = vrot.lane.b32.xlu1 %v2053_v30, %s1766_s7  ;;  %v641_v58 = vrot.slane %v639_v63, 7 }
  0x6c   : > { %956 = vrot.lane.b32.xlu2 %v1923_v27, %s1769_s28  ;;  %v510_v27 = vpack.c.b16 %v500_v49, %v500_v49  ;;  %v1664_v49 = vld [vmem:[%s2430_s3] sm:$0xff] }
  0x6d   : > { %v644_v11 = vor.u32 %v642_v6, %v641_v58  ;;  %v753_v17 = vsel %vm1872_vm2, %v641_v58, %v717_v13 }
  0x6e   : > { %v537_v10 = vshrl.u32 %v510_v27, 16  ;;  %v950_v21 = vshll.u32 %v753_v17, 16  ;;  %v972_v23 = vrot.slane %v753_v17, 1 }
  0x6f   : > { %928 = vrot.lane.b32.xlu0 %v1892_v55, %s1764_s20 }
  0x70   : > { %v952_v28 = vrot.slane %v950_v21, 1 }
  0x73   : > { %976 = vrot.lane.b32.xlu1 %v1909_v5, %s1770_s13  ;;  %v2096_v5 = vsel %vm1872_vm2, %v537_v10, %v644_v11 }
  0x74   : > { %966 = vrot.lane.b32.xlu2 %v2078_v0, %s1769_s28  ;;  %v945_v16 = vshll.u32 %v2096_v5, 16  ;;  %v943_v19 = vshrl.u32 %v2096_v5, 16  ;;  %v971_v22 = vrot.slane %v2096_v5, 1 }
  0x76   : > { %v947_v20 = vrot.slane %v945_v16, 1  ;;  %v2116_v29 = vsel %vm884_vm3, %v971_v22, %v972_v23 }
  0x77   : > { %938 = vrot.lane.b32.xlu0 %v2065_v48, %s1764_s20 }
  0x78   : > { %v948_v26 = vor.u32 %v947_v20, %v943_v19 }
  0x7a   : > { %v2121_v31 = vsel %vm755_vm4, %v948_v26, %v952_v28 }
  0x7b   : > { %986 = vrot.lane.b32.xlu1 %v2088_v8, %s1770_s13 }
  0x7c   : > { %1021 = vrot.lane.b32.xlu2 %v1994_v39, %s1768_s11 }
  0x7e   : > { %v2098_v14 = vpop.permute.xlu2 %991 }
  0x7f   : > { %993 = vrot.lane.b32.xlu0 %v1916_v9, %s1765_s29 }
  0x83   : > { %1041 = vrot.lane.b32.xlu1 %v2016_v2, %s1767_s9 }
  0x84   : > { %858 = vrot.lane.b32.xlu2 %v1994_v39, %s1771_s16 }
  0x86   : > { %v2111_v25 = vpop.permute.xlu2 %930 }
  0x87   : > { %1003 = vrot.lane.b32.xlu0 %v2096_v5, %s1765_s29 }
  0x8b   : > { %915 = vrot.lane.b32.xlu1 %v2016_v2, %s1766_s7  ;;  %v1212_v2 = vpack.c.b16 %v1209_v34, %v1209_v34 }
  0x8c   : > { %1051 = vrot.lane.b32.xlu2 %v2116_v29, %s1767_s9 }
  0x8d   : > { %v1234_v40 = vsel %vm1232_vm5, %v1212_v2, 0 }
  0x8e   : > { %v2125_v39 = vpop.permute.xlu2 %974  ;;  %1241 = vmatpush.bf16.msra.mxu0 %v1234_v40  ;;  %1666 = vmatpush.bf16.msra.mxu1 %v1234_v40 }
  0x8f   : > { %1031 = vrot.lane.b32.xlu0 %v2121_v31, %s1768_s11  ;;  %1667 = vmatpush.bf16.msra.mxu2 %v1234_v40 }
  0x90   : > { %1668 = vmatpush.bf16.msra.mxu3 %v1234_v40 }
  0x92   : > { %1242 = vmatpush.bf16.msra.mxu0 %v1665_v43  ;;  %1669 = vmatpush.bf16.msra.mxu1 %v1665_v43 }
  0x93   : > { %932 = vrot.lane.b32.xlu1 %v1933_v36, %s1764_s20  ;;  %1670 = vmatpush.bf16.msra.mxu2 %v1665_v43 }
  0x94   : > { %919 = vrot.lane.b32.xlu2 %v2036_v18, %s1766_s7  ;;  %1671 = vmatpush.bf16.msra.mxu3 %v1665_v43 }
  0x95   : > { %v2137_v37 = vpop.permute.xlu1 %926 }
  0x96   : > { %v2144_v35 = vpop.permute.xlu2 %856  ;;  %1243 = vmatpush.bf16.msra.mxu0 %v1664_v49  ;;  %1672 = vmatpush.bf16.msra.mxu1 %v1664_v49 }
  0x97   : > { %862 = vrot.lane.b32.xlu0 %v2011_v62, %s1771_s16  ;;  %1673 = vmatpush.bf16.msra.mxu2 %v1664_v49 }
  0x98   : > { %1674 = vmatpush.bf16.msra.mxu3 %v1664_v49 }
  0x99   : > { %v2146_v41 = vpop.permute.xlu0 %913 }
  0x9b   : > { %936 = vrot.lane.b32.xlu1 %v2022_v4, %s1764_s20 }
  0x9c   : > { %980 = vrot.lane.b32.xlu2 %v1987_v32, %s1770_s13  ;;  %v501_v32 = vunpack.c.l.b16 %v480_v52 }
  0x9d   : > { %v2155_v46 = vpop.permute.xlu1 %1039 }
  0x9e   : > { %v2162_v54 = vpop.permute.xlu2 %934  ;;  %v581_v50 = vpack.c.b16 %v571_v57, %v501_v32  ;;  %v511_v1 = vpack.c.b16 %v501_v32, %v501_v32 }
  0x9f   : > { %960 = vrot.lane.b32.xlu0 %v1979_v15, %s1769_s28 }
  0xa0   : > { %v646_v61 = vshrl.u32 %v581_v50, 16  ;;  %v649_v27 = vshll.u32 %v581_v50, 16 }
  0xa1   : > { %v1020_v56 = vpop.permute.xlu0 %1019 }
  0xa2   : > { %v648_v3 = vrot.slane %v646_v61, 7 }
  0xa3   : > { %997 = vrot.lane.b32.xlu1 %v1998_v42, %s1765_s29 }
  0xa4   : > { %984 = vrot.lane.b32.xlu2 %v2053_v30, %s1770_s13  ;;  %v681_v30 = vpack.c.b16 %v571_v57, %v571_v57  ;;  %v651_v6 = vor.u32 %v649_v27, %v648_v3 }
  0xa5   : > { %v955_v60 = vpop.permute.xlu1 %954 }
  0xa6   : > { %v2170_v47 = vpop.permute.xlu2 %995  ;;  %v719_v7 = vshll.u32 %v681_v30, 16 }
  0xa7   : > { %964 = vrot.lane.b32.xlu0 %v2043_v24, %s1769_s28  ;;  %v540_v24 = vshrl.u32 %v511_v1, 16 }
  0xa9   : > { %v910_v15 = vpop.permute.xlu0 %909  ;;  %v744_v11 = vsel %vm1872_vm2, %v540_v24, %v651_v6 }
  0xaa   : > { %v1010_v12 = vshll.u32 %v744_v11, 16  ;;  %v1008_v17 = vshrl.u32 %v744_v11, 16  ;;  %v1036_v44 = vrot.slane %v744_v11, 1 }
  0xab   : > { %1001 = vrot.lane.b32.xlu1 %v2065_v48, %s1765_s29 }
  0xac   : > { %1045 = vrot.lane.b32.xlu2 %v2036_v18, %s1767_s9  ;;  %v1012_v19 = vrot.slane %v1010_v12, 1 }
  0xad   : > { %v861_v63 = vpop.permute.xlu1 %860 }
  0xae   : > { %v2180_v10 = vpop.permute.xlu2 %999  ;;  %v1013_v38 = vor.u32 %v1012_v19, %v1008_v17  ;;  %v1065_v40 = vsel %vm1055_vm6, %v1933_v36, %v861_v63 }
  0xaf   : > { %1025 = vrot.lane.b32.xlu0 %v2011_v62, %s1768_s11  ;;  %v721_v62 = vrot.slane %v719_v7, 3 }
  0xb1   : > { %v918_v58 = vpop.permute.xlu0 %917  ;;  %v754_v21 = vsel %vm1872_vm2, %v648_v3, %v721_v62 }
  0xb2   : > { %v1037_v45 = vrot.slane %v754_v21, 1  ;;  %v1082_v49 = vsel %vm1072_vm7, %v1065_v40, %v918_v58 }
  0xb3   : > { %1049 = vrot.lane.b32.xlu1 %v2088_v8, %s1767_s9  ;;  %v1099_v36 = vsel %vm1089_vm8, %v1082_v49, %v2162_v54 }
  0xb4   : > { %866 = vrot.lane.b32.xlu2 %v2078_v0, %s1771_s16 }
  0xb5   : > { %v959_v18 = vpop.permute.xlu1 %958 }
  0xb6   : > { %v1028_v26 = vpop.permute.xlu2 %1027 }
  0xb7   : > { %1029 = vrot.lane.b32.xlu0 %v2078_v0, %s1768_s11 }
  0xb9   : > { %v853_v13 = vpop.permute.xlu0 %852 }
  0xba   : > { %v1057_v16 = vsel %vm1055_vm6, %v1961_v59, %v853_v13  ;;  %v1015_v59 = vshll.u32 %v754_v21, 16 }
  0xbb   : > { %v1074_v20 = vsel %vm1072_vm7, %v1057_v16, %v910_v15  ;;  %940 = vrot.lane.b32.xlu1 %v2096_v5, %s1764_s20 }
  0xbc   : > { %v1091_v0 = vsel %vm1089_vm8, %v1074_v20, %v2137_v37  ;;  %968 = vrot.lane.b32.xlu2 %v2121_v31, %s1769_s28  ;;  %v1017_v28 = vrot.slane %v1015_v59, 1 }
  0xbd   : > { %v1108_v22 = vsel %vm1106_vm10, %v1091_v0, %v955_v60  ;;  %v963_v23 = vpop.permute.xlu1 %962 }
  0xbe   : > { %v1125_v5 = vsel %vm1123_vm9, %v1108_v22, %v2125_v39  ;;  %v1018_v37 = vsel %vm755_vm4, %v1013_v38, %v1017_v28  ;;  %v865_v39 = vpop.permute.xlu2 %864 }
  0xbf   : > { %923 = vrot.lane.b32.xlu0 %v2088_v8, %s1766_s7  ;;  %v1142_v33 = vsel %vm1140_vm11, %v1125_v5, %v2098_v14  ;;  %v1061_v8 = vsel %vm1055_vm6, %v1892_v55, %v2144_v35  ;;  %v1038_v35 = vsel %vm884_vm3, %v1036_v44, %v1037_v45  ;;  %s1643_s7 = sshll.u32 %s1850_s8, 2  ;;  %s1644_s8 = sshll.u32 %s2447_s22, 1 }
  0xc0   : > { %v1159_v31 = vsel %vm1157_vm12, %v1142_v33, %v1020_v56  ;;  %v1078_v43 = vsel %vm1072_vm7, %v1061_v8, %v2146_v41  ;;  %v1116_v41 = vsel %vm1106_vm10, %v1099_v36, %v963_v23  ;;  %s2302_s28 = scalar_lea.vmem %s2432_s5, %s1643_s7 }
  0xc1   : > { %v979_v34 = vpop.permute.xlu0 %978  ;;  %v1176_v2 = vsel %vm1174_vm13, %v1159_v31, %v2155_v46  ;;  %v1095_v52 = vsel %vm1089_vm8, %v1078_v43, %v2111_v25 }
  0xc2   : > { %1654 = vmatmul.msk.bf16.vlgmr.msra.gmra.mxu0 %vm1215_vm14, %v1176_v2  ;;  %v1112_v55 = vsel %vm1106_vm10, %v1095_v52, %v959_v18 }
  0xc3   : > { %1005 = vrot.lane.b32.xlu1 %v744_v11, %s1765_s29 }
  0xc4   : > { %1033 = vrot.lane.b32.xlu2 %v1018_v37, %s1768_s11 }
  0xc5   : > { %v1024_v14 = vpop.permute.xlu1 %1023 }
  0xc6   : > { %v957_v25 = vpop.permute.xlu2 %956 }
  0xc7   : > { %988 = vrot.lane.b32.xlu0 %v2116_v29, %s1770_s13  ;;  %v1129_v29 = vsel %vm1123_vm9, %v1112_v55, %v979_v34  ;;  %s438_s13 = sadd.s32 %s1644_s8, %s2457_s21 }
  0xc8   : > { %v1146_v32 = vsel %vm1140_vm11, %v1129_v29, %v2170_v47  ;;  %s1645_s16 = sshll.u32 %s438_s13, 1 }
  0xc9   : > { %v983_v46 = vpop.permute.xlu0 %982  ;;  %v1163_v57 = vsel %vm1157_vm12, %v1146_v32, %v1024_v14  ;;  %s440_s19 = scalar_lea.vmem %s2433_s6, %s1645_s16 }
  0xca   : > { %v1133_v56 = vsel %vm1123_vm9, %v1116_v41, %v983_v46 }
  0xcb   : > { %v1150_v50 = vsel %vm1140_vm11, %v1133_v56, %v2180_v10 }
  0xcc   : > { %v1167_v15 = vsel %vm1157_vm12, %v1150_v50, %v1028_v26 }
  0xcd   : > { %v855_v53 = vpop.permute.xlu1 %854 }
  0xce   : > { %v967_v47 = vpop.permute.xlu2 %966  ;;  %v1059_v24 = vsel %vm1055_vm6, %v1886_v51, %v855_v53  ;;  %v1069_v51 = vsel %vm1055_vm6, %v2022_v4, %v865_v39 }
  0xcf   : > { %1053 = vrot.lane.b32.xlu0 %v1038_v35, %s1767_s9 }
  0xd1   : > { %v1044_v60 = vpop.permute.xlu0 %1043 }
  0xd2   : > { %v1180_v54 = vsel %vm1174_vm13, %v1163_v57, %v1044_v60 }
  0xd3   : > { %1656 = vmatmul.msk.bf16.vlgmr.msra.gmra.mxu1 %vm1215_vm14, %v1180_v54 }
  0xd5   : > { %v1048_v61 = vpop.permute.xlu1 %1047 }
  0xd6   : > { %v1184_v63 = vsel %vm1174_vm13, %v1167_v15, %v1048_v61  ;;  %v1022_v30 = vpop.permute.xlu2 %1021 }
  0xd7   : > { %1658 = vmatmul.msk.bf16.vlgmr.msra.gmra.mxu2 %vm1215_vm14, %v1184_v63 }
  0xd9   : > { %v912_v1 = vpop.permute.xlu0 %911 }
  0xda   : > { %v1076_v7 = vsel %vm1072_vm7, %v1059_v24, %v912_v1 }
  0xdd   : > { %v922_v3 = vpop.permute.xlu1 %921 }
  0xde   : > { %v859_v11 = vpop.permute.xlu2 %858  ;;  %v1086_v59 = vsel %vm1072_vm7, %v1069_v51, %v922_v3 }
  0xdf   : > { %v1063_v43 = vsel %vm1055_vm6, %v1916_v9, %v859_v11 }
  0xe1   : > { %v929_v27 = vpop.permute.xlu0 %928 }
  0xe2   : > { %v1093_v10 = vsel %vm1089_vm8, %v1076_v7, %v929_v27 }
  0xe3   : > { %v1110_v12 = vsel %vm1106_vm10, %v1093_v10, %v957_v25  ;;  %v2292_v10 = vld [vmem:[%s2431_s4] ss:$0 sm:$0xff] }
  0xe5   : > { %v977_v58 = vpop.permute.xlu1 %976 }
  0xe6   : > { %v1127_v62 = vsel %vm1123_vm9, %v1110_v12, %v977_v58  ;;  %v1052_v21 = vpop.permute.xlu2 %1051 }
  0xe9   : > { %v939_v6 = vpop.permute.xlu0 %938 }
  0xea   : > { %v1103_v22 = vsel %vm1089_vm8, %v1086_v59, %v939_v6 }
  0xeb   : > { %v1120_v5 = vsel %vm1106_vm10, %v1103_v22, %v967_v47 }
  0xed   : > { %v987_v18 = vpop.permute.xlu1 %986 }
  0xee   : > { %v1137_v26 = vsel %vm1123_vm9, %v1120_v5, %v987_v18  ;;  %v920_v31 = vpop.permute.xlu2 %919 }
  0xf1   : > { %v994_v13 = vpop.permute.xlu0 %993 }
  0xf2   : > { %v1144_v16 = vsel %vm1140_vm11, %v1127_v62, %v994_v13 }
  0xf3   : > { %v1161_v17 = vsel %vm1157_vm12, %v1144_v16, %v1022_v30 }
  0xf5   : > { %v1042_v19 = vpop.permute.xlu1 %1041 }
  0xf6   : > { %v1178_v20 = vsel %vm1174_vm13, %v1161_v17, %v1042_v19  ;;  %v981_v37 = vpop.permute.xlu2 %980 }
  0xf7   : > { %1655 = vmatmul.msk.bf16.gmra.mxu0 %vm1215_vm14, %v1178_v20 }
  0xf9   : > { %v1004_v0 = vpop.permute.xlu0 %1003 }
  0xfa   : > { %v1154_v38 = vsel %vm1140_vm11, %v1137_v26, %v1004_v0 }
  0xfd   : > { %v916_v23 = vpop.permute.xlu1 %915 }
  0xfe   : > { %v985_v40 = vpop.permute.xlu2 %984  ;;  %v1080_v45 = vsel %vm1072_vm7, %v1063_v43, %v916_v23 }
 0x101   : > { %v1032_v28 = vpop.permute.xlu0 %1031 }
 0x102   : > { %v1171_v33 = vsel %vm1157_vm12, %v1154_v38, %v1032_v28 }
 0x103   : > { %v1188_v34 = vsel %vm1174_vm13, %v1171_v33, %v1052_v21 }
 0x104   : > { %1660 = vmatmul.msk.bf16.vlgmr.msra.gmra.mxu3 %vm1215_vm14, %v1188_v34 }
 0x105   : > { %v933_v4 = vpop.permute.xlu1 %932 }
 0x106   : > { %v1097_v46 = vsel %vm1089_vm8, %v1080_v45, %v933_v4  ;;  %v1046_v36 = vpop.permute.xlu2 %1045 }
 0x109   : > { %v863_v2 = vpop.permute.xlu0 %862 }
 0x10a   : > { %v1067_v55 = vsel %vm1055_vm6, %v1998_v42, %v863_v2 }
 0x10b   : > { %v1084_v9 = vsel %vm1072_vm7, %v1067_v55, %v920_v31 }
 0x10d   : > { %v937_v8 = vpop.permute.xlu1 %936 }
 0x10e   : > { %v1101_v32 = vsel %vm1089_vm8, %v1084_v9, %v937_v8  ;;  %v867_v15 = vpop.permute.xlu2 %866 }
 0x10f   : > { %v1071_v63 = vsel %vm1055_vm6, %v2065_v48, %v867_v15 }
 0x111   : > { %v961_v14 = vpop.permute.xlu0 %960 }
 0x112   : > { %v1114_v49 = vsel %vm1106_vm10, %v1097_v46, %v961_v14 }
 0x113   : > { %v1131_v35 = vsel %vm1123_vm9, %v1114_v49, %v981_v37 }
 0x115   : > { %v998_v39 = vpop.permute.xlu1 %997 }
 0x116   : > { %v1148_v29 = vsel %vm1140_vm11, %v1131_v35, %v998_v39  ;;  %v969_v27 = vpop.permute.xlu2 %968 }
 0x119   : > { %v965_v44 = vpop.permute.xlu0 %964 }
 0x11a   : > { %v1118_v25 = vsel %vm1106_vm10, %v1101_v32, %v965_v44 }
 0x11b   : > { %v1135_v42 = vsel %vm1123_vm9, %v1118_v25, %v985_v40 }
 0x11d   : > { %v1002_v52 = vpop.permute.xlu1 %1001 }
 0x11e   : > { %v1152_v60 = vsel %vm1140_vm11, %v1135_v42, %v1002_v52  ;;  %v1034_v18 = vpop.permute.xlu2 %1033 }
 0x121   : > { %v1026_v53 = vpop.permute.xlu0 %1025 }
 0x122   : > { %v1165_v41 = vsel %vm1157_vm12, %v1148_v29, %v1026_v53 }
 0x123   : > { %v1182_v56 = vsel %vm1174_vm13, %v1165_v41, %v1046_v36 }
 0x124   : > { %1657 = vmatmul.msk.bf16.gmra.mxu1 %vm1215_vm14, %v1182_v56 }
 0x125   : > { %v1050_v57 = vpop.permute.xlu1 %1049 }
 0x129   : > { %v1030_v50 = vpop.permute.xlu0 %1029 }
 0x12a   : > { %v1169_v54 = vsel %vm1157_vm12, %v1152_v60, %v1030_v50 }
 0x12b   : > { %v1186_v61 = vsel %vm1174_vm13, %v1169_v54, %v1050_v57 }
 0x12c   : > { %1659 = vmatmul.msk.bf16.gmra.mxu2 %vm1215_vm14, %v1186_v61 }
 0x12d   : > { %v941_v47 = vpop.permute.xlu1 %940 }
 0x131   : > { %v924_v1 = vpop.permute.xlu0 %923 }
 0x132   : > { %v1088_v3 = vsel %vm1072_vm7, %v1071_v63, %v924_v1 }
 0x133   : > { %v1105_v30 = vsel %vm1089_vm8, %v1088_v3, %v941_v47 }
 0x134   : > { %v1122_v24 = vsel %vm1106_vm10, %v1105_v30, %v969_v27 }
 0x135   : > { %v1006_v7 = vpop.permute.xlu1 %1005 }
 0x139   : > { %v989_v58 = vpop.permute.xlu0 %988 }
 0x13a   : > { %v1139_v6 = vsel %vm1123_vm9, %v1122_v24, %v989_v58 }
 0x13b   : > { %v1156_v48 = vsel %vm1140_vm11, %v1139_v6, %v1006_v7 }
 0x13c   : > { %v1173_v62 = vsel %vm1157_vm12, %v1156_v48, %v1034_v18 }
 0x13f   : > { %v1245_v11 = vpop.f32.mrf.mxu0 }
 0x140   : > { %v1246_v12 = vadd.f32 %v2292_v10, %v1245_v11 }
 0x141   : > { %v1054_v13 = vpop.permute.xlu0 %1053 }
 0x142   : > { %v1285_v16 = vmax.f32 %v1246_v12, 0.0  ;;  %v1190_v17 = vsel %vm1174_vm13, %v1173_v62, %v1054_v13 }
 0x143   : > { %1661 = vmatmul.msk.bf16.gmra.mxu3 %vm1215_vm14, %v1190_v17 }
 0x144   : > { %v1301_v19 = vpack.c.bf16 %v1285_v16, %v1285_v16  ;;  %v1371_v21 = vmul.f32 %v1285_v16, %v1285_v16  ;;  %v1334_v59 = vsel %vm1174_vm13, %v1285_v16, 0.0 }
 0x146   : > { %1318 = vst.msk [vmem:[%s2302_s28] sm:$0xf] %vm1317_vm15, %v1301_v19  ;;  %v1387_v38 = vsel %vm1174_vm13, %v1371_v21, 0.0 }
 0x147   : > { %v1247_v20 = vpop.f32.mrf.mxu0 }
 0x148   : > { %v1248_v51 = vadd.f32 %v2292_v10, %v1247_v20 }
 0x14a   : > { %v1286_v0 = vmax.f32 %v1248_v51, 0.0 }
 0x14c   : > { %v1302_v22 = vpack.c.bf16 %v1286_v0, %v1286_v0  ;;  %v1335_v23 = vsel %vm1174_vm13, %v1286_v0, 0.0  ;;  %v1372_v5 = vmul.f32 %v1286_v0, %v1286_v0 }
 0x14d   : > { %v1336_v26 = vadd.f32 %v1335_v23, %v1334_v59 }
 0x14e   : > { %1319 = vst.msk [vmem:[%s2302_s28 + $0x4] sm:$0xf] %vm1317_vm15, %v1302_v22  ;;  %v1388_v28 = vsel %vm1174_vm13, %v1372_v5, 0.0 }
 0x14f   : > { %v1389_v33 = vadd.f32 %v1388_v28, %v1387_v38 }
 0x150   : > { %v1255_v31 = vpop.f32.mrf.mxu1 }
 0x151   : > { %v1256_v34 = vadd.f32 %v2292_v10, %v1255_v31 }
 0x153   : > { %v1289_v4 = vmax.f32 %v1256_v34, 0.0 }
 0x155   : > { %v1305_v2 = vpack.c.bf16 %v1289_v4, %v1289_v4  ;;  %v1375_v50 = vmul.f32 %v1289_v4, %v1289_v4  ;;  %v1341_v1 = vsel %vm1174_vm13, %v1289_v4, 0.0 }
 0x157   : > { %1322 = vst.msk [vmem:[%s2302_s28 + $0x10] sm:$0xf] %vm1317_vm15, %v1305_v2  ;;  %v1394_v58 = vsel %vm1174_vm13, %v1375_v50, 0.0 }
 0x158   : > { %v1257_v37 = vpop.f32.mrf.mxu1 }
 0x159   : > { %v1258_v8 = vadd.f32 %v2292_v10, %v1257_v37 }
 0x15a   : > { %v1265_v14 = vpop.f32.mrf.mxu2 }
 0x15b   : > { %v1290_v39 = vmax.f32 %v1258_v8, 0.0  ;;  %v1266_v40 = vadd.f32 %v2292_v10, %v1265_v14 }
 0x15d   : > { %v1306_v43 = vpack.c.bf16 %v1290_v39, %v1290_v39  ;;  %v2319_v44 = vmax.f32 %v1266_v40, 0.0  ;;  %v1376_v47 = vmul.f32 %v1290_v39, %v1290_v39  ;;  %v1343_v24 = vsel %vm1174_vm13, %v1290_v39, 0.0 }
 0x15f   : > { %1323 = vst.msk [vmem:[%s2302_s28 + $0x14] sm:$0xf] %vm1317_vm15, %v1306_v43  ;;  %v1309_v45 = vpack.c.bf16 %v2319_v44, %v2319_v44  ;;  %v1396_v48 = vsel %vm1174_vm13, %v1376_v47, 0.0  ;;  %v1379_v31 = vmul.f32 %v2319_v44, %v2319_v44  ;;  %v1349_v39 = vsel %vm1174_vm13, %v2319_v44, 0.0 }
 0x161   : > { %1326 = vst.msk [vmem:[%s2302_s28 + $0x20] sm:$0xf] %vm1317_vm15, %v1309_v45 }
 0x162   : > { %v1267_v46 = vpop.f32.mrf.mxu2 }
 0x163   : > { %v1268_v49 = vadd.f32 %v2292_v10, %v1267_v46 }
 0x165   : > { %v2328_v52 = vmax.f32 %v1268_v49, 0.0 }
 0x167   : > { %v1310_v55 = vpack.c.bf16 %v2328_v52, %v2328_v52  ;;  %v1380_v40 = vmul.f32 %v2328_v52, %v2328_v52 }
 0x169   : > { %1327 = vst.msk [vmem:[%s2302_s28 + $0x24] sm:$0xf] %vm1317_vm15, %v1310_v55  ;;  %v1402_v55 = vsel %vm1174_vm13, %v1379_v31, 0.0  ;;  %v1404_v44 = vsel %vm1174_vm13, %v1380_v40, 0.0 }
 0x174   : > { %v1250_v35 = vpop.f32.mrf.mxu0 }
 0x175   : > { %v1251_v36 = vadd.f32 %v2292_v10, %v1250_v35  ;;  %v1351_v35 = vsel %vm1174_vm13, %v2328_v52, 0.0 }
 0x177   : > { %v1287_v29 = vmax.f32 %v1251_v36, 0.0 }
 0x179   : > { %v1303_v53 = vpack.c.bf16 %v1287_v29, %v1287_v29  ;;  %v1337_v41 = vsel %vm1174_vm13, %v1287_v29, 0.0  ;;  %v1373_v9 = vmul.f32 %v1287_v29, %v1287_v29 }
 0x17a   : > { %v1338_v56 = vadd.f32 %v1337_v41, %v1336_v26 }
 0x17b   : > { %1320 = vst.msk [vmem:[%s2302_s28 + $0x8] sm:$0xf] %vm1317_vm15, %v1303_v53  ;;  %v1390_v32 = vsel %vm1174_vm13, %v1373_v9, 0.0 }
 0x17c   : > { %v1391_v25 = vadd.f32 %v1390_v32, %v1389_v33  ;;  %v1252_v57 = vpop.f32.mrf.mxu0 }
 0x17d   : > { %v1253_v42 = vadd.f32 %v2292_v10, %v1252_v57 }
 0x17f   : > { %v1288_v60 = vmax.f32 %v1253_v42, 0.0 }
 0x181   : > { %v1304_v54 = vpack.c.bf16 %v1288_v60, %v1288_v60  ;;  %v1339_v15 = vsel %vm1174_vm13, %v1288_v60, 0.0  ;;  %v1374_v61 = vmul.f32 %v1288_v60, %v1288_v60 }
 0x182   : > { %v1340_v63 = vadd.f32 %v1339_v15, %v1338_v56 }
 0x183   : > { %1321 = vst.msk [vmem:[%s2302_s28 + $0xc] sm:$0xf] %vm1317_vm15, %v1304_v54  ;;  %v1392_v3 = vsel %vm1174_vm13, %v1374_v61, 0.0 }
 0x184   : > { %v1342_v27 = vadd.f32 %v1341_v1, %v1340_v63  ;;  %v1393_v30 = vadd.f32 %v1392_v3, %v1391_v25 }
 0x186   : > { %v1395_v6 = vadd.f32 %v1394_v58, %v1393_v30  ;;  %v1344_v7 = vadd.f32 %v1343_v24, %v1342_v27 }
 0x187   : > { %v1275_v18 = vpop.f32.mrf.mxu3 }
 0x188   : > { %v1276_v11 = vadd.f32 %v2292_v10, %v1275_v18  ;;  %v1397_v12 = vadd.f32 %v1396_v48, %v1395_v6 }
 0x18a   : > { %v1297_v62 = vmax.f32 %v1276_v11, 0.0 }
 0x18c   : > { %v1313_v13 = vpack.c.bf16 %v1297_v62, %v1297_v62  ;;  %v1383_v50 = vmul.f32 %v1297_v62, %v1297_v62  ;;  %v1357_v47 = vsel %vm1174_vm13, %v1297_v62, 0.0 }
 0x18e   : > { %1330 = vst.msk [vmem:[%s2302_s28 + $0x30] sm:$0xf] %vm1317_vm15, %v1313_v13  ;;  %v1410_v58 = vsel %vm1174_vm13, %v1383_v50, 0.0 }
 0x18f   : > { %v1277_v16 = vpop.f32.mrf.mxu3 }
 0x190   : > { %v1278_v17 = vadd.f32 %v2292_v10, %v1277_v16 }
 0x192   : > { %v2352_v19 = vmax.f32 %v1278_v17, 0.0 }
 0x194   : > { %v1314_v20 = vpack.c.bf16 %v2352_v19, %v2352_v19  ;;  %v1384_v11 = vmul.f32 %v2352_v19, %v2352_v19  ;;  %v1359_v13 = vsel %vm1174_vm13, %v2352_v19, 0.0 }
 0x196   : > { %1331 = vst.msk [vmem:[%s2302_s28 + $0x34] sm:$0xf] %vm1317_vm15, %v1314_v20 }
 0x1a1   : > { %v1260_v51 = vpop.f32.mrf.mxu1 }
 0x1a2   : > { %v1261_v21 = vadd.f32 %v2292_v10, %v1260_v51  ;;  %v1412_v51 = vsel %vm1174_vm13, %v1384_v11, 0.0 }
 0x1a4   : > { %v1291_v0 = vmax.f32 %v1261_v21, 0.0 }
 0x1a6   : > { %v1307_v59 = vpack.c.bf16 %v1291_v0, %v1291_v0  ;;  %v1377_v22 = vmul.f32 %v1291_v0, %v1291_v0  ;;  %v1345_v5 = vsel %vm1174_vm13, %v1291_v0, 0.0 }
 0x1a7   : > { %v1346_v33 = vadd.f32 %v1345_v5, %v1344_v7 }
 0x1a8   : > { %1324 = vst.msk [vmem:[%s2302_s28 + $0x18] sm:$0xf] %vm1317_vm15, %v1307_v59  ;;  %v1398_v38 = vsel %vm1174_vm13, %v1377_v22, 0.0 }
 0x1a9   : > { %v1262_v23 = vpop.f32.mrf.mxu1  ;;  %v1399_v37 = vadd.f32 %v1398_v38, %v1397_v12 }
 0x1aa   : > { %v1263_v26 = vadd.f32 %v2292_v10, %v1262_v23 }
 0x1ac   : > { %v1292_v28 = vmax.f32 %v1263_v26, 0.0 }
 0x1ae   : > { %v1308_v34 = vpack.c.bf16 %v1292_v28, %v1292_v28  ;;  %v1347_v4 = vsel %vm1174_vm13, %v1292_v28, 0.0  ;;  %v1378_v2 = vmul.f32 %v1292_v28, %v1292_v28 }
 0x1af   : > { %v1348_v8 = vadd.f32 %v1347_v4, %v1346_v33  ;;  %v1270_v14 = vpop.f32.mrf.mxu2 }
 0x1b0   : > { %1325 = vst.msk [vmem:[%s2302_s28 + $0x1c] sm:$0xf] %vm1317_vm15, %v1308_v34  ;;  %v1400_v43 = vsel %vm1174_vm13, %v1378_v2, 0.0  ;;  %v1271_v45 = vadd.f32 %v2292_v10, %v1270_v14 }
 0x1b1   : > { %v1350_v46 = vadd.f32 %v1349_v39, %v1348_v8  ;;  %v1401_v49 = vadd.f32 %v1400_v43, %v1399_v37 }
 0x1b2   : > { %v1295_v36 = vmax.f32 %v1271_v45, 0.0 }
 0x1b3   : > { %v1403_v29 = vadd.f32 %v1402_v55, %v1401_v49  ;;  %v1352_v53 = vadd.f32 %v1351_v35, %v1350_v46 }
 0x1b4   : > { %v1311_v41 = vpack.c.bf16 %v1295_v36, %v1295_v36  ;;  %v1381_v56 = vmul.f32 %v1295_v36, %v1295_v36  ;;  %v1353_v25 = vsel %vm1174_vm13, %v1295_v36, 0.0 }
 0x1b5   : > { %v1405_v9 = vadd.f32 %v1404_v44, %v1403_v29  ;;  %v1354_v52 = vadd.f32 %v1353_v25, %v1352_v53 }
 0x1b6   : > { %1328 = vst.msk [vmem:[%s2302_s28 + $0x28] sm:$0xf] %vm1317_vm15, %v1311_v41  ;;  %v1406_v42 = vsel %vm1174_vm13, %v1381_v56, 0.0 }
 0x1b7   : > { %v1272_v32 = vpop.f32.mrf.mxu2  ;;  %v1407_v63 = vadd.f32 %v1406_v42, %v1405_v9 }
 0x1b8   : > { %v1273_v57 = vadd.f32 %v2292_v10, %v1272_v32 }
 0x1ba   : > { %v1296_v60 = vmax.f32 %v1273_v57, 0.0 }
 0x1bc   : > { %v1312_v54 = vpack.c.bf16 %v1296_v60, %v1296_v60  ;;  %v1355_v15 = vsel %vm1174_vm13, %v1296_v60, 0.0  ;;  %v1382_v61 = vmul.f32 %v1296_v60, %v1296_v60 }
 0x1bd   : > { %v1356_v1 = vadd.f32 %v1355_v15, %v1354_v52 }
 0x1be   : > { %1329 = vst.msk [vmem:[%s2302_s28 + $0x2c] sm:$0xf] %vm1317_vm15, %v1312_v54  ;;  %v1408_v3 = vsel %vm1174_vm13, %v1382_v61, 0.0 }
 0x1bf   : > { %v1358_v27 = vadd.f32 %v1357_v47, %v1356_v1  ;;  %v1409_v30 = vadd.f32 %v1408_v3, %v1407_v63 }
 0x1c1   : > { %v1411_v24 = vadd.f32 %v1410_v58, %v1409_v30  ;;  %v1360_v20 = vadd.f32 %v1359_v13, %v1358_v27 }
 0x1c3   : > { %v1413_v22 = vadd.f32 %v1412_v51, %v1411_v24 }
 0x1c6   : > { %v1280_v6 = vpop.f32.mrf.mxu3 }
 0x1c7   : > { %v1281_v7 = vadd.f32 %v2292_v10, %v1280_v6 }
 0x1c9   : > { %v1299_v48 = vmax.f32 %v1281_v7, 0.0 }
 0x1cb   : > { %v1315_v18 = vpack.c.bf16 %v1299_v48, %v1299_v48  ;;  %v1385_v12 = vmul.f32 %v1299_v48, %v1299_v48  ;;  %v1361_v16 = vsel %vm1174_vm13, %v1299_v48, 0.0 }
 0x1cc   : > { %v1362_v59 = vadd.f32 %v1361_v16, %v1360_v20 }
 0x1cd   : > { %1332 = vst.msk [vmem:[%s2302_s28 + $0x38] sm:$0xf] %vm1317_vm15, %v1315_v18  ;;  %v1414_v21 = vsel %vm1174_vm13, %v1385_v12, 0.0 }
 0x1ce   : > { %v1282_v62 = vpop.f32.mrf.mxu3  ;;  %v1415_v38 = vadd.f32 %v1414_v21, %v1413_v22 }
 0x1cf   : > { %v1283_v17 = vadd.f32 %v2292_v10, %v1282_v62 }
 0x1d1   : > { %v1300_v0 = vmax.f32 %v1283_v17, 0.0 }
 0x1d3   : > { %v1316_v23 = vpack.c.bf16 %v1300_v0, %v1300_v0  ;;  %v1363_v5 = vsel %vm1174_vm13, %v1300_v0, 0.0  ;;  %v1386_v26 = vmul.f32 %v1300_v0, %v1300_v0 }
 0x1d4   : > { %v1364_v19 = vadd.f32 %v1363_v5, %v1362_v59 }
 0x1d5   : > { %1333 = vst.msk [vmem:[%s2302_s28 + $0x3c] sm:$0xf] %vm1317_vm15, %v1316_v23  ;;  %v1416_v10 = vsel %vm1174_vm13, %v1386_v26, 0.0 }
 0x1d6   : > { %v1365_v28 = vrot.slane %v1364_v19, 4  ;;  %v1417_v33 = vadd.f32 %v1416_v10, %v1415_v38 }
 0x1d8   : > { %v1366_v31 = vadd.f32 %v1365_v28, %v1364_v19  ;;  %v1418_v34 = vrot.slane %v1417_v33, 4 }
 0x1da   : > { %v1367_v4 = vrot.slane %v1366_v31, 2  ;;  %v1419_v2 = vadd.f32 %v1418_v34, %v1417_v33 }
 0x1dc   : > { %v1368_v37 = vadd.f32 %v1367_v4, %v1366_v31  ;;  %v1420_v8 = vrot.slane %v1419_v2, 2 }
 0x1de   : > { %v1369_v14 = vrot.slane %v1368_v37, 1  ;;  %v1421_v39 = vadd.f32 %v1420_v8, %v1419_v2 }
 0x1e0   : > { %v1422_v40 = vrot.slane %v1421_v39, 1  ;;  %v1370_v43 = vadd.f32 %v1369_v14, %v1368_v37 }
 0x1e2   : > { %v1423_v45 = vadd.f32 %v1422_v40, %v1421_v39 }
 0x1e4   : > { %v1425_v46 = vsel %vm732_vm0, %v1370_v43, %v1423_v45 }
 0x1e5   : > { %1427 = vst.msk [vmem:[%s440_s19] sm:$0x3] %vm1426_vm1, %v1425_v46 }
 0x1e6 PF: > { %s17_s25 = sadd.s32 1, %s1762_s25   ;;  %s2436_s21 = smov %s1754_s23 }
 0x1e7   : > { %p14_p12 = scmp.ge.s32.totalorder %s17_s25, 6   ;;  %s2437_s22 = smov %s1758_s24 }
 0x1e8   : > { %s2438_s23 = smov %s2441_s26  ;;  %s2439_s24 = smov %s2445_s27 }
 0x1e9   :  { %16 = sbr.rel (!%p14_p12) target bundleno = 3 (0x3), region = 88 }

// kernel: block_forward.4
= control target key start
LH: loop header
LB: loop body
LE: loop exit
PB: predicated region body
PF: predicated region fallthrough
CT: control target
= control target key end

     0   :  { %s2091_s21 = smov 0   ;;  %s2093_s22 = smov 0   ;;  %s2781_s0 = inlined_call_operand.vmem [shape: bf16[2,16,16,32], index: 0, kind: input, shape index: {}, may-alias: {0,1,2}]   ;;  %s2782_s1 = inlined_call_operand.vmem [shape: bf16[2,16,16,32], index: 1, kind: input, shape index: {}, may-alias: {0,1,2}]   ;;  %s2783_s2 = inlined_call_operand.vmem [shape: bf16[2,16,16,32], index: 2, kind: input, shape index: {}, may-alias: {0,1,2}]   ;;  %s2784_s3 = inlined_call_operand.vmem [shape: bf16[288,32], index: 3, kind: input, shape index: {}]   ;;  %s2785_s4 = inlined_call_operand.vmem [shape: f32[1,32], index: 4, kind: input, shape index: {}]   ;;  %s2786_s5 = inlined_call_operand.vmem [shape: bf16[2,16,16,32], index: 5, kind: output, shape index: {0}]   ;;  %s2787_s6 = inlined_call_operand.vmem [shape: f32[2,2,2,32], index: 6, kind: output, shape index: {1}]  }
   0x1   :  { %s2095_s23 = smov 0   ;;  %s2097_s24 = smov 0  }
   0x2   :  { %s2099_s25 = smov 0  }
   0x3 LB: > { %s26_s26 = sadd.s32 1, %s2043_s23  ;;  %s29_s27 = sadd.s32 1, %s2047_s24  ;;  %s2051_s25 = sphi %s2099_s25, %s17_s25   ;;  %s2047_s24 = sphi %s2097_s24, %s2793_s24   ;;  %s2043_s23 = sphi %s2095_s23, %s2792_s23   ;;  %s2039_s22 = sphi %s2093_s22, %s2791_s22   ;;  %s2035_s21 = sphi %s2091_s21, %s2790_s21  }
   0x4   : > { %p27_p0 = scmp.ge.s32.totalorder %s26_s26, 2  ;;  %p1786_p1 = scmp.ge.s32.totalorder %s2051_s25, 1 }
   0x5   : > { %p303_p2 = scmp.lt.s32.totalorder %s2051_s25, 5 }
   0x6   : > { %s2795_s26 = smov (%p27_p0, %s26_s26), 0  ;;  %s2797_s27 = smov (!%p27_p0, %s29_s27), %s2047_s24 }
   0x7   : > { %p304_p3 = pnand %p1786_p1, %p303_p2  ;;  %p31_p4 = scmp.ge.s32.totalorder %s2797_s27, 2 }
   0x8   : > { %s2124_s28 = sshll.u32 (!%p304_p3), %s2035_s21, 3  ;;  %p381_p5 = scmp.lt.s32.totalorder (!%p304_p3), %s2039_s22, 1 }
   0x9   : > { %s2799_s27 = smov (%p31_p4, %s2797_s27), 0  ;;  %307 = sbr.rel (%p304_p3) target bundleno = 438 (0x1b6), region = 40 }
   0xa   : > { %p397_p6 = scmp.lt.s32.totalorder (!%p304_p3), %s2124_s28, 15  ;;  %s1788_s9 = sadd.s32 (!%p304_p3), 4294967295, %s2124_s28 }
   0xb   : > { %p379_p7 = scmp.lt.s32.totalorder (!%p304_p3), %s1788_s9, 0  ;;  %s406_s14 = sadd.s32 (!%p304_p3), 8, %s2124_s28 }
   0xc   : > { %p407_p9 = scmp.gt.s32.totalorder (!%p304_p3), %s406_s14, 15  ;;  %s2053_s17 = smov (!%p304_p3), 96  }
   0xd   : > { %s2054_s19 = smov (!%p304_p3), 64   ;;  %s2055_s11 = smov (!%p304_p3), 32  }
   0xe   : > { %s2801_s22 = smov (!%p381_p5, %s2039_s22), 1  ;;  %vm712_vm0 = vcmask 1040384   ;;  %vm713_vm1 = vsmask.f32 256  ;;  %s2803_s9 = smov (%p379_p7, %s1788_s9), 1  ;;  %vm864_vm3 = vcmask 1046528  }
   0xf   : > { %s398_s29 = scalar_select %p397_p6, %s2124_s28, 15  ;;  %vm2150_vm2 = vmand %vm712_vm0, %vm713_vm1  ;;  %vm735_vm4 = vsmask.f32 7424  ;;  %vm1003_vm5 = vcmask 261120   ;;  %vm1020_vm6 = vcmask 523264   ;;  %vm1037_vm7 = vcmask 785408  }
  0x10   : > { %s2131_s30 = sshll.u32 %s2801_s22, 5  ;;  %p383_p8 = scmp.lt.s32.totalorder %s2803_s9, 15  ;;  %vm1477_vm8 = vcmask 257024   ;;  %vm1586_vm9 = vcmask 254976  }
  0x11   : > { %s1793_s7 = sshll.u32 %s398_s29, 1  ;;  %s2807_s14 = smov (%p407_p9, %s406_s14), 14 }
  0x12   : > { %s2134_s8 = sadd.s32 %s1793_s7, %s2131_s30  ;;  %s2805_s9 = smov (!%p383_p8, %s2803_s9), 15 }
  0x13   : > { %s1795_s10 = sshll.u32 %s2134_s8, 2  ;;  %s1789_s15 = sshll.u32 %s2805_s9, 1 }
  0x14   : > { %s2143_s13 = scalar_lea.vmem %s2782_s1, %s1795_s10  ;;  %s387_s16 = sadd.s32 %s2131_s30, %s1789_s15 }
  0x15   : > { %v1911_v0 = vld [vmem:[%s2143_s13] sm:$0xff]   ;;  %v1946_v1 = vld [vmem:[%s2143_s13 + $0x8] sm:$0xff]   ;;  %v2155_v20 = vld [vmem:[%s2143_s13 + $0x10] sm:$0xff]   ;;  %p411_p10 = scmp.lt.s32.totalorder %s2807_s14, 15  ;;  %s1791_s18 = sshll.u32 %s387_s16, 2 }
  0x16   : > { %v1912_v2 = vunpack.c.l.b16 %v1911_v0  ;;  %v570_v3 = vshrl.u32 %v1911_v0, 16  ;;  %v573_v4 = vshll.u32 %v1911_v0, 16  ;;  %v1916_v5 = vunpack.c.l.b16 %v1946_v1  ;;  %s389_s29 = scalar_lea.vmem %s2781_s0, %s1791_s18  ;;  %s2613_s18 = scalar_lea.vmem %s2786_s5, %s1795_s10 }
  0x17   : > { %v1917_v6 = vunpack.c.h.b16 %v1946_v1  ;;  %v577_v7 = vshrl.u32 %v1946_v1, 16  ;;  %v580_v8 = vshll.u32 %v1946_v1, 16  ;;  %v1913_v9 = vunpack.c.h.b16 %v1911_v0  ;;  %v1907_v36 = vld [vmem:[%s389_s29] sm:$0xff]   ;;  %s2809_s14 = smov (!%p411_p10, %s2807_s14), 15  ;;  %p435_p11 = scmp.lt.s32.totalorder %s2035_s21, 1 }
  0x18   : > { %v483_v10 = vpack.c.b16 %v1912_v2, %v1912_v2  ;;  %v572_v11 = vrot.slane %v570_v3, 7  ;;  %v484_v12 = vpack.c.b16 %v1916_v5, %v1916_v5  ;;  %v1920_v28 = vunpack.c.l.b16 %v2155_v20  ;;  %s1797_s7 = sshll.u32 %s2809_s14, 1  ;;  %s1804_s8 = sshll.u32 %s2801_s22, 1 }
  0x19   : > { %v579_v14 = vrot.slane %v577_v7, 7  ;;  %v654_v15 = vpack.c.b16 %v1917_v6, %v1917_v6  ;;  %v653_v16 = vpack.c.b16 %v1913_v9, %v1913_v9  ;;  %v584_v32 = vshrl.u32 %v2155_v20, 16  ;;  %s2190_s9 = sadd.s32 %s1797_s7, %s2131_s30  ;;  %s2811_s21 = smov (!%p435_p11, %s2035_s21), 1 }
  0x1a   : > { %v496_v17 = vshrl.u32 %v483_v10, 16  ;;  %v575_v18 = vor.u32 %v573_v4, %v572_v11  ;;  %v499_v19 = vshrl.u32 %v484_v12, 16  ;;  %v1908_v42 = vunpack.c.l.b16 %v1907_v36  ;;  %v1950_v4 = vld [vmem:[%s2143_s13 + $0x28] sm:$0xff]   ;;  %s1799_s20 = sshll.u32 %s2190_s9, 2  ;;  %s438_s10 = sadd.s32 %s1804_s8, %s2811_s21 }
  0x1b   : > { %v582_v21 = vor.u32 %v580_v8, %v579_v14  ;;  %v671_v22 = vshll.u32 %v654_v15, 16  ;;  %v667_v23 = vshll.u32 %v653_v16, 16  ;;  %v1909_v43 = vunpack.c.h.b16 %v1907_v36 }
  0x1c   : > { %v2159_v24 = vsel %vm2150_vm2, %v496_v17, %v575_v18  ;;  %v563_v44 = vshrl.u32 %v1907_v36, 16  ;;  %v566_v45 = vshll.u32 %v1907_v36, 16  ;;  %v485_v48 = vpack.c.b16 %v1920_v28, %v1920_v28 }
  0x1d   : > { %906 = vrot.lane.b32.xlu1 %v2159_v24, %s2053_s17  ;;  %v673_v25 = vrot.slane %v671_v22, 3  ;;  %v2166_v26 = vsel %vm2150_vm2, %v499_v19, %v582_v21  ;;  %v669_v27 = vrot.slane %v667_v23, 3  ;;  %v868_v30 = vrot.slane %v2159_v24, 1 }
  0x1e   : > { %v871_v29 = vrot.slane %v2166_v26, 1  ;;  %v751_v31 = vshll.u32 %v2159_v24, 16  ;;  %955 = vrot.lane.b32.xlu2 %v2166_v26, %s2054_s19  ;;  %v749_v35 = vshrl.u32 %v2159_v24, 16  ;;  %v763_v37 = vshll.u32 %v2166_v26, 16 }
  0x1f   : > { %v727_v33 = vsel %vm2150_vm2, %v579_v14, %v673_v25  ;;  %v726_v34 = vsel %vm2150_vm2, %v572_v11, %v669_v27  ;;  %v586_v49 = vrot.slane %v584_v32, 7  ;;  %v482_v50 = vpack.c.b16 %v1908_v42, %v1908_v42 }
  0x20   : > { %v872_v38 = vrot.slane %v727_v33, 1  ;;  %v869_v39 = vrot.slane %v726_v34, 1  ;;  %v753_v40 = vrot.slane %v751_v31, 1  ;;  %v756_v41 = vshll.u32 %v726_v34, 16 }
  0x21   : > { %v565_v51 = vrot.slane %v563_v44, 7  ;;  %v652_v52 = vpack.c.b16 %v1909_v43, %v1909_v43  ;;  %v761_v53 = vshrl.u32 %v2166_v26, 16  ;;  %v765_v56 = vrot.slane %v763_v37, 1 }
  0x22   : > { %v2186_v46 = vsel %vm864_vm3, %v871_v29, %v872_v38  ;;  %v870_v47 = vsel %vm864_vm3, %v868_v30, %v869_v39  ;;  %v754_v54 = vor.u32 %v753_v40, %v749_v35  ;;  %v758_v55 = vrot.slane %v756_v41, 1  ;;  %v1948_v38 = vld [vmem:[%s2143_s13 + $0x18] sm:$0xff]  }
  0x23   : > { %940 = vrot.lane.b32.xlu0 %v2186_v46, %s2055_s11  ;;  %v768_v57 = vshll.u32 %v727_v33, 16  ;;  %v493_v58 = vshrl.u32 %v482_v50, 16  ;;  %v568_v59 = vor.u32 %v566_v45, %v565_v51  ;;  %v663_v60 = vshll.u32 %v652_v52, 16 }
  0x24   : > { %v587_v61 = vshll.u32 %v2155_v20, 16  ;;  %v766_v63 = vor.u32 %v765_v56, %v761_v53  ;;  %v1921_v1 = vunpack.c.h.b16 %v2155_v20  ;;  %v2201_v2 = vsel %vm735_vm4, %v754_v54, %v758_v55 }
  0x25   : > { %938 = vrot.lane.b32.xlu1 %v870_v47, %s2055_s11  ;;  %v665_v62 = vrot.slane %v663_v60, 3  ;;  %v770_v0 = vrot.slane %v768_v57, 1  ;;  %v502_v3 = vshrl.u32 %v485_v48, 16  ;;  %v2206_v5 = vsel %vm2150_vm2, %v493_v58, %v568_v59 }
  0x26   : > { %908 = vrot.lane.b32.xlu2 %v2166_v26, %s2053_s17  ;;  %v589_v7 = vor.u32 %v587_v61, %v586_v49  ;;  %v655_v8 = vpack.c.b16 %v1921_v1, %v1921_v1  ;;  %v739_v9 = vshll.u32 %v2206_v5, 16  ;;  %v1932_v12 = vunpack.c.l.b16 %v1950_v4  ;;  %v1951_v1 = vld [vmem:[%s2143_s13 + $0x30] sm:$0xff]  }
  0x27   : > { %v725_v6 = vsel %vm2150_vm2, %v565_v51, %v665_v62  ;;  %v2214_v10 = vsel %vm735_vm4, %v766_v63, %v770_v0  ;;  %v1933_v14 = vunpack.c.h.b16 %v1950_v4  ;;  %v865_v15 = vrot.slane %v2206_v5, 1 }
  0x28   : > { %v675_v11 = vshll.u32 %v655_v8, 16  ;;  %v866_v16 = vrot.slane %v725_v6, 1  ;;  %v605_v17 = vshrl.u32 %v1950_v4, 16  ;;  %v2220_v18 = vsel %vm2150_vm2, %v502_v3, %v589_v7 }
  0x29   : > { %v737_v19 = vshrl.u32 %v2206_v5, 16  ;;  %v741_v21 = vrot.slane %v739_v9, 1  ;;  %v658_v22 = vpack.c.b16 %v1933_v14, %v1933_v14  ;;  %v773_v23 = vshrl.u32 %v2220_v18, 16 }
  0x2a   : > { %v677_v20 = vrot.slane %v675_v11, 3  ;;  %v775_v25 = vshll.u32 %v2220_v18, 16  ;;  %v488_v28 = vpack.c.b16 %v1932_v12, %v1932_v12  ;;  %v607_v29 = vrot.slane %v605_v17, 7 }
  0x2b   : > { %834 = vrot.lane.b32.xlu0 %v2201_v2, %s2055_s11  ;;  %v608_v30 = vshll.u32 %v1950_v4, 16  ;;  %v867_v31 = vsel %vm864_vm3, %v865_v15, %v866_v16  ;;  %v744_v32 = vshll.u32 %v725_v6, 16  ;;  %v687_v35 = vshll.u32 %v658_v22, 16 }
  0x2c   : > { %v2229_v27 = vsel %vm2150_vm2, %v586_v49, %v677_v20  ;;  %v777_v33 = vrot.slane %v775_v25, 1  ;;  %v511_v39 = vshrl.u32 %v488_v28, 16  ;;  %v742_v41 = vor.u32 %v741_v21, %v737_v19 }
  0x2d   : > { %891 = vrot.lane.b32.xlu1 %v870_v47, %s2054_s19  ;;  %v780_v34 = vshll.u32 %v2229_v27, 16  ;;  %v610_v40 = vor.u32 %v608_v30, %v607_v29  ;;  %v746_v42 = vrot.slane %v744_v32, 1  ;;  %v1925_v44 = vunpack.c.h.b16 %v1948_v38 }
  0x2e   : > { %983 = vrot.lane.b32.xlu2 %v2214_v10, %s2053_s17  ;;  %v778_v36 = vor.u32 %v777_v33, %v773_v23  ;;  %v1924_v45 = vunpack.c.l.b16 %v1948_v38  ;;  %v591_v47 = vshrl.u32 %v1948_v38, 16  ;;  %v689_v48 = vrot.slane %v687_v35, 3  ;;  %v1949_v33 = vld [vmem:[%s2143_s13 + $0x20] sm:$0xff]  }
  0x2f   : > { %v782_v37 = vrot.slane %v780_v34, 1  ;;  %v2244_v49 = vsel %vm2150_vm2, %v511_v39, %v610_v40  ;;  %v747_v50 = vsel %vm735_vm4, %v742_v41, %v746_v42  ;;  %v656_v52 = vpack.c.b16 %v1925_v44, %v1925_v44 }
  0x30   : > { %v811_v51 = vshll.u32 %v2244_v49, 16  ;;  %v486_v53 = vpack.c.b16 %v1924_v45, %v1924_v45  ;;  %v593_v54 = vrot.slane %v591_v47, 7  ;;  %v594_v55 = vshll.u32 %v1948_v38, 16 }
  0x31   : > { %v2236_v43 = vsel %vm735_vm4, %v778_v36, %v782_v37  ;;  %v731_v56 = vsel %vm2150_vm2, %v607_v29, %v689_v48  ;;  %v809_v57 = vshrl.u32 %v2244_v49, 16  ;;  %v679_v60 = vshll.u32 %v656_v52, 16 }
  0x32   : > { %v813_v58 = vrot.slane %v811_v51, 1  ;;  %v816_v59 = vshll.u32 %v731_v56, 16  ;;  %v505_v61 = vshrl.u32 %v486_v53, 16  ;;  %v596_v62 = vor.u32 %v594_v55, %v593_v54 }
  0x33   : > { %889 = vrot.lane.b32.xlu0 %v867_v31, %s2054_s19  ;;  %v681_v3 = vrot.slane %v679_v60, 3  ;;  %v1936_v4 = vunpack.c.l.b16 %v1951_v1  ;;  %v612_v6 = vshrl.u32 %v1951_v1, 16  ;;  %v1937_v8 = vunpack.c.h.b16 %v1951_v1 }
  0x34   : > { %v814_v63 = vor.u32 %v813_v58, %v809_v57  ;;  %v818_v0 = vrot.slane %v816_v59, 1  ;;  %v2259_v7 = vsel %vm2150_vm2, %v505_v61, %v596_v62  ;;  %v874_v11 = vrot.slane %v2220_v18, 1  ;;  %v1952_v57 = vld [vmem:[%s2143_s13 + $0x38] sm:$0xff]   ;;  %s417_s13 = scalar_lea.vmem %s2783_s2, %s1799_s20  ;;  %s1805_s20 = sshll.u32 %s438_s10, 1 }
  0x35   : > { %957 = vrot.lane.b32.xlu1 %v2220_v18, %s2054_s19  ;;  %v875_v12 = vrot.slane %v2229_v27, 1  ;;  %v787_v14 = vshll.u32 %v2259_v7, 16  ;;  %v2273_v15 = vsel %vm2150_vm2, %v593_v54, %v681_v3  ;;  %v489_v16 = vpack.c.b16 %v1936_v4, %v1936_v4  ;;  %s440_s9 = scalar_lea.vmem %s2787_s6, %s1805_s20 }
  0x36   : > { %985 = vrot.lane.b32.xlu2 %v2236_v43, %s2053_s17  ;;  %v2264_v9 = vsel %vm735_vm4, %v814_v63, %v818_v0  ;;  %v614_v17 = vrot.slane %v612_v6, 7  ;;  %v615_v19 = vshll.u32 %v1951_v1, 16  ;;  %v883_v20 = vrot.slane %v2244_v49, 1  ;;  %v2323_v1 = vld [vmem:[%s2784_s3 + $0x78] sm:$0xff] }
  0x37   : > { %v884_v21 = vrot.slane %v731_v56, 1  ;;  %v659_v22 = vpack.c.b16 %v1937_v8, %v1937_v8  ;;  %v2279_v23 = vsel %vm864_vm3, %v874_v11, %v875_v12  ;;  %v785_v25 = vshrl.u32 %v2259_v7, 16  ;;  %1347 = vmatpush.bf16.msra.mxu1 %v2323_v1 }
  0x38   : > { %v789_v27 = vrot.slane %v787_v14, 1  ;;  %v792_v28 = vshll.u32 %v2273_v15, 16  ;;  %v514_v29 = vshrl.u32 %v489_v16, 16  ;;  %v617_v30 = vor.u32 %v615_v19, %v614_v17  ;;  %v2338_v16 = vld [vmem:[%s2784_s3 + $0x70] sm:$0xff] }
  0x39   : > { %v2284_v31 = vsel %vm864_vm3, %v883_v20, %v884_v21  ;;  %v691_v32 = vshll.u32 %v659_v22, 16  ;;  %v1929_v37 = vunpack.c.h.b16 %v1949_v33  ;;  %v1928_v38 = vunpack.c.l.b16 %v1949_v33 }
  0x3a   : > { %v790_v34 = vor.u32 %v789_v27, %v785_v25  ;;  %v794_v35 = vrot.slane %v792_v28, 1  ;;  %v2293_v36 = vsel %vm2150_vm2, %v514_v29, %v617_v30  ;;  %v598_v39 = vshrl.u32 %v1949_v33, 16  ;;  %v2361_v30 = vld [vmem:[%s2784_s3 + $0x68] sm:$0xff] }
  0x3b   : > { %832 = vrot.lane.b32.xlu0 %v747_v50, %s2055_s11  ;;  %v693_v40 = vrot.slane %v691_v32, 3  ;;  %v823_v42 = vshll.u32 %v2293_v36, 16  ;;  %v657_v44 = vpack.c.b16 %v1929_v37, %v1929_v37  ;;  %v487_v45 = vpack.c.b16 %v1928_v38, %v1928_v38  ;;  %1348 = vmatpush.bf16.msra.mxu1 %v2338_v16  ;;  %v2382_v38 = vld [vmem:[%s2784_s3 + $0x58] sm:$0xff] }
  0x3c   : > { %v2298_v41 = vsel %vm735_vm4, %v790_v34, %v794_v35  ;;  %v600_v47 = vrot.slane %v598_v39, 7  ;;  %v601_v48 = vshll.u32 %v1949_v33, 16  ;;  %v821_v51 = vshrl.u32 %v2293_v36, 16  ;;  %v2369_v34 = vld [vmem:[%s2784_s3 + $0x60] sm:$0xff]  ;;  %v1905_v39 = vld [vmem:[%s2784_s3 + $0x88] sm:$0xff] }
  0x3d   : > { %893 = vrot.lane.b32.xlu1 %v2186_v46, %s2054_s19  ;;  %v732_v50 = vsel %vm2150_vm2, %v614_v17, %v693_v40  ;;  %v825_v52 = vrot.slane %v823_v42, 1  ;;  %v683_v54 = vshll.u32 %v657_v44, 16  ;;  %v508_v55 = vshrl.u32 %v487_v45, 16  ;;  %1402 = vmatpush.bf16.msra.mxu2 %v1905_v39  ;;  %v2395_v44 = vld [vmem:[%s2784_s3 + $0x50] sm:$0xff]  ;;  %v1895_v45 = vld [vmem:[%s2784_s3 + $0x38] sm:$0xff] }
  0x3e   : > { %910 = vrot.lane.b32.xlu2 %v2220_v18, %s2053_s17  ;;  %v828_v53 = vshll.u32 %v732_v50, 16  ;;  %v603_v56 = vor.u32 %v601_v48, %v600_v47  ;;  %v1940_v60 = vunpack.c.l.b16 %v1952_v57  ;;  %v619_v61 = vshrl.u32 %v1952_v57, 16  ;;  %1298 = vmatpush.bf16.msra.mxu0 %v1895_v45 }
  0x3f   : > { %v826_v58 = vor.u32 %v825_v52, %v821_v51  ;;  %v685_v62 = vrot.slane %v683_v54, 3  ;;  %v622_v6 = vshll.u32 %v1952_v57, 16  ;;  %v877_v8 = vrot.slane %v2259_v7, 1  ;;  %1349 = vmatpush.bf16.msra.mxu1 %v2361_v30  ;;  %1953 = vmatpush.bf16.msra.mxu3 %v1895_v45  ;;  %v2415_v52 = vld [vmem:[%s2784_s3 + $0x48] sm:$0xff] }
  0x40   : > { %v830_v59 = vrot.slane %v828_v53, 1  ;;  %v2313_v63 = vsel %vm2150_vm2, %v508_v55, %v603_v56  ;;  %v490_v3 = vpack.c.b16 %v1940_v60, %v1940_v60  ;;  %v621_v4 = vrot.slane %v619_v61, 7 }
  0x41   : > { %v878_v11 = vrot.slane %v2273_v15, 1  ;;  %v799_v12 = vshll.u32 %v2313_v63, 16  ;;  %v2332_v14 = vsel %vm2150_vm2, %v600_v47, %v685_v62  ;;  %v886_v17 = vrot.slane %v2293_v36, 1  ;;  %v1904_v47 = vld [vmem:[%s2784_s3 + $0x80] sm:$0xff] }
  0x42   : > { %v2318_v0 = vsel %vm735_vm4, %v826_v58, %v830_v59  ;;  %v887_v19 = vrot.slane %v732_v50, 1  ;;  %v517_v15 = vshrl.u32 %v490_v3, 16  ;;  %v624_v20 = vor.u32 %v622_v6, %v621_v4  ;;  %1403 = vmatpush.bf16.msra.mxu2 %v1904_v47  ;;  %v1894_v58 = vld [vmem:[%s2784_s3 + $0x30] sm:$0xff]  ;;  %v1943_v59 = vld [vmem:[%s417_s13] sm:$0xff]   ;;  %v1893_v6 = vld [vmem:[%s2784_s3 + $0x28] sm:$0xff] }
  0x43   : > { %836 = vrot.lane.b32.xlu0 %v2214_v10, %s2055_s11  ;;  %v2344_v21 = vsel %vm864_vm3, %v877_v8, %v878_v11  ;;  %v797_v22 = vshrl.u32 %v2313_v63, 16  ;;  %v801_v25 = vrot.slane %v799_v12, 1  ;;  %v804_v27 = vshll.u32 %v2332_v14, 16  ;;  %1350 = vmatpush.bf16.msra.mxu1 %v2369_v34  ;;  %v2437_v62 = vld [vmem:[%s2784_s3 + $0x40] sm:$0xff] }
  0x44   : > { %v2350_v28 = vsel %vm864_vm3, %v886_v17, %v887_v19  ;;  %v2356_v29 = vsel %vm2150_vm2, %v517_v15, %v624_v20  ;;  %v1941_v37 = vunpack.c.h.b16 %v1952_v57  ;;  %v880_v56 = vrot.slane %v2313_v63, 1  ;;  %1299 = vmatpush.bf16.msra.mxu0 %v1894_v58  ;;  %1954 = vmatpush.bf16.msra.mxu3 %v1894_v58  ;;  %v1892_v12 = vld [vmem:[%s2784_s3 + $0x20] sm:$0xff]  ;;  %v1891_v20 = vld [vmem:[%s2784_s3 + $0x18] sm:$0xff] }
  0x45   : > { %959 = vrot.lane.b32.xlu1 %v2259_v7, %s2054_s19  ;;  %v802_v32 = vor.u32 %v801_v25, %v797_v22  ;;  %v806_v33 = vrot.slane %v804_v27, 1  ;;  %v925_v50 = vshll.u32 %v2356_v29, 16  ;;  %v923_v53 = vshrl.u32 %v2356_v29, 16  ;;  %1878 = vmatmul.msk.bf16.vlgmr.msra.gmra.mxu2 %vm1003_vm5, %v2186_v46 }
  0x46   : > { %844 = vrot.lane.b32.xlu2 %v2264_v9, %s2055_s11  ;;  %v660_v40 = vpack.c.b16 %v1941_v37, %v1941_v37  ;;  %v881_v57 = vrot.slane %v2332_v14, 1  ;;  %v1944_v46 = vunpack.c.l.b16 %v1943_v59  ;;  %v626_v8 = vshrl.u32 %v1943_v59, 16 }
  0x47   : > { %v2374_v35 = vsel %vm735_vm4, %v802_v32, %v806_v33  ;;  %1351 = vmatpush.bf16.msra.mxu1 %v2382_v38  ;;  %v927_v54 = vrot.slane %v925_v50, 1  ;;  %v629_v19 = vshll.u32 %v1943_v59, 16  ;;  %v1945_v22 = vunpack.c.h.b16 %v1943_v59  ;;  %v1890_v33 = vld [vmem:[%s2784_s3 + $0x10] sm:$0xff]  ;;  %v1889_v50 = vld [vmem:[%s2784_s3 + $0x8] sm:$0xff] }
  0x48   : > { %v695_v42 = vshll.u32 %v660_v40, 16  ;;  %v2440_v3 = vsel %vm864_vm3, %v880_v56, %v881_v57  ;;  %1300 = vmatpush.bf16.msra.mxu0 %v1893_v6  ;;  %1955 = vmatpush.bf16.msra.mxu3 %v1893_v6  ;;  %v491_v14 = vpack.c.b16 %v1944_v46, %v1944_v46  ;;  %v628_v17 = vrot.slane %v626_v8, 7 }
  0x49   : > { %v928_v60 = vor.u32 %v927_v54, %v923_v53  ;;  %v661_v32 = vpack.c.b16 %v1945_v22, %v1945_v22 }
  0x4a   : > { %v697_v48 = vrot.slane %v695_v42, 3  ;;  %v520_v25 = vshrl.u32 %v491_v14, 16  ;;  %v631_v27 = vor.u32 %v629_v19, %v628_v17  ;;  %v935_v42 = vrot.slane %v2356_v29, 1 }
  0x4b   : > { %942 = vrot.lane.b32.xlu0 %v2279_v23, %s2055_s11  ;;  %1352 = vmatpush.bf16.msra.mxu1 %v2395_v44  ;;  %v699_v37 = vshll.u32 %v661_v32, 16 }
  0x4c   : > { %v2408_v51 = vsel %vm2150_vm2, %v621_v4, %v697_v48  ;;  %1301 = vmatpush.bf16.msra.mxu0 %v1892_v12  ;;  %1956 = vmatpush.bf16.msra.mxu3 %v1892_v12  ;;  %v2474_v39 = vsel %vm2150_vm2, %v520_v25, %v631_v27 }
  0x4d   : > { %901 = vrot.lane.b32.xlu1 %v2284_v31, %s2054_s19  ;;  %v930_v55 = vshll.u32 %v2408_v51, 16  ;;  %v974_v40 = vshll.u32 %v2474_v39, 16  ;;  %v936_v45 = vrot.slane %v2408_v51, 1  ;;  %v701_v47 = vrot.slane %v699_v37, 3 }
  0x4e   : > { %918 = vrot.lane.b32.xlu2 %v2293_v36, %s2053_s17 }
  0x4f   : > { %1353 = vmatpush.bf16.msra.mxu1 %v2415_v52  ;;  %v932_v61 = vrot.slane %v930_v55, 1  ;;  %v2488_v53 = vsel %vm2150_vm2, %v628_v17, %v701_v47  ;;  %v976_v54 = vrot.slane %v974_v40, 1  ;;  %v1888_v55 = vld [vmem:[%s2784_s3] sm:$0xff] }
  0x50   : > { %1302 = vmatpush.bf16.msra.mxu0 %v1891_v20  ;;  %1957 = vmatpush.bf16.msra.mxu3 %v1891_v20  ;;  %v979_v51 = vshll.u32 %v2488_v53, 16 }
  0x51   : > { %v2451_v11 = vsel %vm735_vm4, %v928_v60, %v932_v61 }
  0x52   : > { %v981_v57 = vrot.slane %v979_v51, 1 }
  0x53   : > { %987 = vrot.lane.b32.xlu0 %v2298_v41, %s2053_s17  ;;  %1354 = vmatpush.bf16.msra.mxu1 %v2437_v62 }
  0x54   : > { %1303 = vmatpush.bf16.msra.mxu0 %v1890_v33  ;;  %1958 = vmatpush.bf16.msra.mxu3 %v1890_v33 }
  0x55   : > { %895 = vrot.lane.b32.xlu1 %v2279_v23, %s2054_s19  ;;  %1879 = vmatmul.msk.bf16.gmra.mxu2 %vm1003_vm5, %v2279_v23  ;;  %v972_v23 = vshrl.u32 %v2474_v39, 16 }
  0x56   : > { %912 = vrot.lane.b32.xlu2 %v2259_v7, %s2053_s17 }
  0x57   : > { %v977_v56 = vor.u32 %v976_v54, %v972_v23 }
  0x58   : > { %1304 = vmatpush.bf16.msra.mxu0 %v1889_v50  ;;  %1959 = vmatpush.bf16.msra.mxu3 %v1889_v50 }
  0x59   : > { %v982_v59 = vsel %vm735_vm4, %v977_v56, %v981_v57 }
  0x5b   : > { %838 = vrot.lane.b32.xlu0 %v2236_v43, %s2055_s11 }
  0x5c   : > { %1305 = vmatpush.bf16.msra.mxu0 %v1888_v55  ;;  %1960 = vmatpush.bf16.msra.mxu3 %v1888_v55 }
  0x5d   : > { %961 = vrot.lane.b32.xlu1 %v2313_v63, %s2054_s19 }
  0x5e   : > { %846 = vrot.lane.b32.xlu2 %v2318_v0, %s2055_s11 }
  0x60   : > { %1961 = vmatpush.bf16.msrb.mxu3 %v2323_v1 }
  0x63   : > { %944 = vrot.lane.b32.xlu0 %v2344_v21, %s2055_s11 }
  0x64   : > { %1962 = vmatpush.bf16.msrb.mxu3 %v2338_v16 }
  0x65   : > { %903 = vrot.lane.b32.xlu1 %v2350_v28, %s2054_s19  ;;  %1880 = vmatmul.msk.bf16.gmra.mxu2 %vm1003_vm5, %v2344_v21 }
  0x66   : > { %920 = vrot.lane.b32.xlu2 %v2356_v29, %s2053_s17 }
  0x68   : > { %1963 = vmatpush.bf16.msrb.mxu3 %v2361_v30 }
  0x6b   : > { %989 = vrot.lane.b32.xlu0 %v2374_v35, %s2053_s17 }
  0x6c   : > { %1964 = vmatpush.bf16.msrb.mxu3 %v2369_v34 }
  0x6d   : > { %897 = vrot.lane.b32.xlu1 %v2344_v21, %s2054_s19 }
  0x6e   : > { %914 = vrot.lane.b32.xlu2 %v2313_v63, %s2053_s17 }
  0x70   : > { %1965 = vmatpush.bf16.msrb.mxu3 %v2382_v38 }
  0x73   : > { %840 = vrot.lane.b32.xlu0 %v2298_v41, %s2055_s11 }
  0x74   : > { %1966 = vmatpush.bf16.msrb.mxu3 %v2395_v44 }
  0x75   : > { %963 = vrot.lane.b32.xlu1 %v2244_v49, %s2054_s19  ;;  %1881 = vmatmul.msk.bf16.gmra.mxu2 %vm1003_vm5, %v2440_v3 }
  0x76   : > { %950 = vrot.lane.b32.xlu2 %v2350_v28, %s2055_s11 }
  0x78   : > { %v2442_v4 = vpop.permute.xlu2 %955  ;;  %1967 = vmatpush.bf16.msrb.mxu3 %v2415_v52 }
  0x7b   : > { %946 = vrot.lane.b32.xlu0 %v2440_v3, %s2055_s11 }
  0x7c   : > { %1968 = vmatpush.bf16.msrb.mxu3 %v2437_v62 }
  0x7d   : > { %967 = vrot.lane.b32.xlu1 %v2356_v29, %s2054_s19  ;;  %v2494_v29 = vsel %vm864_vm3, %v935_v42, %v936_v45 }
  0x7e   : > { %995 = vrot.lane.b32.xlu2 %v2451_v11, %s2053_s17 }
  0x80   : > { %v2460_v15 = vpop.permute.xlu2 %908 }
  0x83   : > { %991 = vrot.lane.b32.xlu0 %v2264_v9, %s2053_s17 }
  0x85   : > { %899 = vrot.lane.b32.xlu1 %v2440_v3, %s2054_s19  ;;  %1882 = vmatmul.msk.bf16.gmra.mxu2 %vm1003_vm5, %v2284_v31 }
  0x86   : > { %916 = vrot.lane.b32.xlu2 %v2244_v49, %s2053_s17 }
  0x88   : > { %v984_v48 = vpop.permute.xlu2 %983 }
  0x8b   : > { %842 = vrot.lane.b32.xlu0 %v2374_v35, %s2055_s11 }
  0x8d   : > { %965 = vrot.lane.b32.xlu1 %v2293_v36, %s2054_s19 }
  0x8e   : > { %952 = vrot.lane.b32.xlu2 %v2494_v29, %s2055_s11 }
  0x8f   : > { %v907_v13 = vpop.permute.xlu1 %906 }
  0x90   : > { %v986_v58 = vpop.permute.xlu2 %985 }
  0x93   : > { %948 = vrot.lane.b32.xlu0 %v2284_v31, %s2055_s11 }
  0x95   : > { %v941_v60 = vpop.permute.xlu0 %940  ;;  %969 = vrot.lane.b32.xlu1 %v2474_v39, %s2054_s19  ;;  %1883 = vmatmul.msk.bf16.gmra.mxu2 %vm1003_vm5, %v2350_v28 }
  0x96   : > { %997 = vrot.lane.b32.xlu2 %v982_v59, %s2053_s17  ;;  %v1067_v30 = vsel %vm1003_vm5, %v2214_v10, %v941_v60 }
  0x97   : > { %v939_v61 = vpop.permute.xlu1 %938 }
  0x98   : > { %v1064_v1 = vsel %vm1003_vm5, %v2201_v2, %v939_v61  ;;  %v911_v6 = vpop.permute.xlu2 %910 }
  0x99   : > { %v1087_v46 = vsel %vm1020_vm6, %v1064_v1, %v2442_v4 }
  0x9a   : > { %v1103_v8 = vsel %vm1037_vm7, %v1087_v46, %v984_v48 }
  0x9b   : > { %993 = vrot.lane.b32.xlu0 %v2318_v0, %s2053_s17  ;;  %1355 = vmatmul.bf16.vlgmr.msra.gmra.mxu1 %v1103_v8 }
  0x9d   : > { %v835_v16 = vpop.permute.xlu0 %834 }
  0x9e   : > { %v1007_v25 = vsel %vm1003_vm5, %v2159_v24, %v835_v16  ;;  %v1000_v16 = vrot.slane %v2474_v39, 1 }
  0x9f   : > { %v892_v21 = vpop.permute.xlu1 %891 }
  0xa0   : > { %v845_v12 = vpop.permute.xlu2 %844  ;;  %v1024_v62 = vsel %vm1020_vm6, %v1007_v25, %v892_v21 }
  0xa1   : > { %v1042_v37 = vsel %vm1037_vm7, %v1024_v62, %v2460_v15 }
  0xa5   : > { %v890_v2 = vpop.permute.xlu0 %889  ;;  %1884 = vmatmul.msk.bf16.gmra.mxu2 %vm1003_vm5, %v2494_v29 }
  0xa7   : > { %v958_v4 = vpop.permute.xlu1 %957 }
  0xa8   : > { %v1089_v14 = vsel %vm1020_vm6, %v1067_v30, %v958_v4  ;;  %v919_v34 = vpop.permute.xlu2 %918 }
  0xa9   : > { %v1106_v17 = vsel %vm1037_vm7, %v1089_v14, %v986_v58 }
  0xab   : > { %1360 = vmatmul.bf16.gmra.mxu1 %v1106_v17 }
  0xad   : > { %v833_v38 = vpop.permute.xlu0 %832 }
  0xae   : > { %v1005_v44 = vsel %vm1003_vm5, %v2206_v5, %v833_v38  ;;  %v1017_v5 = vsel %vm1003_vm5, %v2244_v49, %v845_v12 }
  0xaf   : > { %v894_v19 = vpop.permute.xlu1 %893  ;;  %v1022_v3 = vsel %vm1020_vm6, %v1005_v44, %v890_v2 }
  0xb0   : > { %v1039_v10 = vsel %vm1037_vm7, %v1022_v3, %v907_v13  ;;  %v913_v22 = vpop.permute.xlu2 %912 }
  0xb1   : > { %1306 = vmatmul.bf16.vlgmr.msra.gmra.mxu0 %v1039_v10 }
  0xb5   : > { %v837_v20 = vpop.permute.xlu0 %836 }
  0xb6   : > { %v1009_v15 = vsel %vm1003_vm5, %v2166_v26, %v837_v20 }
  0xb7   : > { %v960_v52 = vpop.permute.xlu1 %959  ;;  %v1026_v23 = vsel %vm1020_vm6, %v1009_v15, %v894_v19  ;;  %v2603_v15 = vld [vmem:[%s2785_s4] ss:$0 sm:$0xff] }
  0xb8   : > { %v847_v40 = vpop.permute.xlu2 %846 }
  0xb9   : > { %v1019_v55 = vsel %vm1003_vm5, %v2293_v36, %v847_v40 }
  0xbd   : > { %v943_v27 = vpop.permute.xlu0 %942 }
  0xbe   : > { %v1070_v42 = vsel %vm1003_vm5, %v2236_v43, %v943_v27  ;;  %v1045_v43 = vsel %vm1037_vm7, %v1026_v23, %v911_v6 }
  0xbf   : > { %v902_v32 = vpop.permute.xlu1 %901  ;;  %v1091_v45 = vsel %vm1020_vm6, %v1070_v42, %v960_v52 }
  0xc0   : > { %v1034_v33 = vsel %vm1020_vm6, %v1017_v5, %v902_v32  ;;  %v921_v48 = vpop.permute.xlu2 %920 }
  0xc1   : > { %1311 = vmatmul.bf16.gmra.mxu0 %v1042_v37  ;;  %v1057_v31 = vsel %vm1037_vm7, %v1034_v33, %v919_v34 }
  0xc2   : > { %1336 = vmatmul.bf16.vlgmr.msra.gmra.mxu3 %v1057_v31 }
  0xc5   : > { %v988_v24 = vpop.permute.xlu0 %987 }
  0xc6   : > { %v1109_v49 = vsel %vm1037_vm7, %v1091_v45, %v988_v24 }
  0xc7   : > { %1365 = vmatmul.bf16.gmra.mxu1 %v1109_v49  ;;  %v896_v47 = vpop.permute.xlu1 %895 }
  0xc8   : > { %v915_v51 = vpop.permute.xlu2 %914  ;;  %v1405_v3 = vpop.f32.mrf.mxu2 }
  0xcd   : > { %v839_v50 = vpop.permute.xlu0 %838 }
  0xce   : > { %v1011_v57 = vsel %vm1003_vm5, %v2220_v18, %v839_v50 }
  0xcf   : > { %v962_v54 = vpop.permute.xlu1 %961  ;;  %v1028_v36 = vsel %vm1020_vm6, %v1011_v57, %v896_v47 }
  0xd0   : > { %v951_v29 = vpop.permute.xlu2 %950  ;;  %v1048_v6 = vsel %vm1037_vm7, %v1028_v36, %v913_v22  ;;  %v1407_v27 = vpop.f32.mrf.mxu2 }
  0xd1   : > { %1316 = vmatmul.bf16.gmra.mxu0 %v1045_v43  ;;  %v1082_v2 = vsel %vm1003_vm5, %v2318_v0, %v951_v29 }
  0xd5   : > { %v945_v13 = vpop.permute.xlu0 %944 }
  0xd6   : > { %v1073_v58 = vsel %vm1003_vm5, %v2298_v41, %v945_v13  ;;  %v1001_v41 = vrot.slane %v2488_v53, 1 }
  0xd7   : > { %v904_v28 = vpop.permute.xlu1 %903  ;;  %v1093_v60 = vsel %vm1020_vm6, %v1073_v58, %v962_v54 }
  0xd8   : > { %v1036_v56 = vsel %vm1020_vm6, %v1019_v55, %v904_v28  ;;  %v996_v18 = vpop.permute.xlu2 %995  ;;  %v1002_v12 = vsel %vm864_vm3, %v1000_v16, %v1001_v41 }
  0xd9   : > { %v1060_v26 = vsel %vm1037_vm7, %v1036_v56, %v921_v48  ;;  %1885 = vmatmul.msk.bf16.gmra.mxu2 %vm1003_vm5, %v1002_v12 }
  0xda   : > { %1341 = vmatmul.bf16.gmra.mxu3 %v1060_v26 }
  0xdd   : > { %v990_v59 = vpop.permute.xlu0 %989 }
  0xde   : > { %v1112_v61 = vsel %vm1037_vm7, %v1093_v60, %v990_v59 }
  0xdf   : > { %1370 = vmatmul.bf16.gmra.mxu1 %v1112_v61  ;;  %v898_v1 = vpop.permute.xlu1 %897 }
  0xe0   : > { %v917_v34 = vpop.permute.xlu2 %916 }
  0xe1   : > { %1321 = vmatmul.bf16.gmra.mxu0 %v1048_v6 }
  0xe5   : > { %v841_v46 = vpop.permute.xlu0 %840 }
  0xe6   : > { %v1013_v21 = vsel %vm1003_vm5, %v2259_v7, %v841_v46 }
  0xe7   : > { %v964_v8 = vpop.permute.xlu1 %963  ;;  %v1030_v4 = vsel %vm1020_vm6, %v1013_v21, %v898_v1 }
  0xe8   : > { %v1051_v39 = vsel %vm1037_vm7, %v1030_v4, %v915_v51  ;;  %v953_v10 = vpop.permute.xlu2 %952 }
  0xe9   : > { %v1085_v62 = vsel %vm1003_vm5, %v2451_v11, %v953_v10  ;;  %v1410_v11 = vpop.f32.mrf.mxu2 }
  0xed   : > { %v947_v30 = vpop.permute.xlu0 %946 }
  0xee   : > { %v1076_v7 = vsel %vm1003_vm5, %v2374_v35, %v947_v30 }
  0xef   : > { %v968_v14 = vpop.permute.xlu1 %967  ;;  %v1095_v44 = vsel %vm1020_vm6, %v1076_v7, %v964_v8 }
  0xf0   : > { %v1099_v17 = vsel %vm1020_vm6, %v1082_v2, %v968_v14  ;;  %v998_v32 = vpop.permute.xlu2 %997 }
  0xf1   : > { %1326 = vmatmul.bf16.gmra.mxu0 %v1051_v39  ;;  %v1121_v53 = vsel %vm1037_vm7, %v1099_v17, %v996_v18  ;;  %v1412_v45 = vpop.f32.mrf.mxu2 }
  0xf2   : > { %1385 = vmatmul.bf16.vlgmr.msrb.gmra.mxu3 %v1121_v53 }
  0xf5   : > { %v992_v38 = vpop.permute.xlu0 %991 }
  0xf6   : > { %v1115_v0 = vsel %vm1037_vm7, %v1095_v44, %v992_v38 }
  0xf7   : > { %1375 = vmatmul.bf16.gmra.mxu1 %v1115_v0  ;;  %v900_v19 = vpop.permute.xlu1 %899 }
  0xf9   : > { %v1415_v49 = vpop.f32.mrf.mxu2 }
  0xfd   : > { %v843_v20 = vpop.permute.xlu0 %842 }
  0xfe   : > { %v1015_v22 = vsel %vm1003_vm5, %v2313_v63, %v843_v20 }
  0xff   : > { %v966_v52 = vpop.permute.xlu1 %965  ;;  %v1032_v25 = vsel %vm1020_vm6, %v1015_v22, %v900_v19 }
 0x100   : > { %v1054_v35 = vsel %vm1037_vm7, %v1032_v25, %v917_v34 }
 0x101   : > { %1331 = vmatmul.bf16.gmra.mxu0 %v1054_v35  ;;  %v2605_v48 = vpop.f32.mrf.mxu2 }
 0x105   : > { %v949_v5 = vpop.permute.xlu0 %948 }
 0x106   : > { %v1079_v63 = vsel %vm1003_vm5, %v2264_v9, %v949_v5 }
 0x107   : > { %v970_v33 = vpop.permute.xlu1 %969  ;;  %v1097_v42 = vsel %vm1020_vm6, %v1079_v63, %v966_v52 }
 0x108   : > { %v1101_v37 = vsel %vm1020_vm6, %v1085_v62, %v970_v33 }
 0x109   : > { %v1124_v40 = vsel %vm1037_vm7, %v1101_v37, %v998_v32  ;;  %v1420_v56 = vpop.f32.mrf.mxu2 }
 0x10a   : > { %1390 = vmatmul.bf16.gmra.mxu3 %v1124_v40 }
 0x10d   : > { %v994_v31 = vpop.permute.xlu0 %993 }
 0x10e   : > { %v1118_v24 = vsel %vm1037_vm7, %v1097_v42, %v994_v31 }
 0x10f   : > { %1380 = vmatmul.bf16.gmra.mxu1 %v1118_v24 }
 0x111   : > { %v1422_v21 = vpop.f32.mrf.mxu2 }
 0x118   : > { %v1356_v47 = vpop.f32.mrf.mxu1 }
 0x120   : > { %v1358_v23 = vpop.f32.mrf.mxu1 }
 0x128   : > { %v1361_v57 = vpop.f32.mrf.mxu1 }
 0x12e   : > { %v1307_v9 = vpop.f32.mrf.mxu0 }
 0x12f   : > { %v1308_v50 = vadd.f32 %v2603_v15, %v1307_v9 }
 0x130   : > { %v1363_v30 = vpop.f32.mrf.mxu1 }
 0x131   : > { %v1357_v54 = vadd.f32 %v1356_v47, %v1308_v50 }
 0x133   : > { %v1406_v43 = vadd.f32 %v1405_v3, %v1357_v54  ;;  %v1425_v3 = vpop.f32.mrf.mxu2 }
 0x135   : > { %v1445_v51 = vmax.f32 %v1406_v43, 0.0 }
 0x136   : > { %v1309_v55 = vpop.f32.mrf.mxu0 }
 0x137   : > { %v1461_v13 = vpack.c.bf16 %v1445_v51, %v1445_v51  ;;  %v1310_v28 = vadd.f32 %v2603_v15, %v1309_v55  ;;  %v1531_v59 = vmul.f32 %v1445_v51, %v1445_v51  ;;  %v1494_v36 = vsel %vm1003_vm5, %v1445_v51, 0.0 }
 0x139   : > { %1478 = vst.msk [vmem:[%s2613_s18] sm:$0xf] %vm1477_vm8, %v1461_v13  ;;  %v1359_v26 = vadd.f32 %v1358_v23, %v1310_v28  ;;  %v1547_v18 = vsel %vm1003_vm5, %v1531_v59, 0.0 }
 0x13b   : > { %v1408_v58 = vadd.f32 %v1407_v27, %v1359_v26  ;;  %v1427_v32 = vpop.f32.mrf.mxu2 }
 0x13d   : > { %v1446_v60 = vmax.f32 %v1408_v58, 0.0 }
 0x13e   : > { %v1312_v61 = vpop.f32.mrf.mxu0 }
 0x13f   : > { %v1462_v29 = vpack.c.bf16 %v1446_v60, %v1446_v60  ;;  %v1495_v1 = vsel %vm1003_vm5, %v1446_v60, 0.0  ;;  %v1532_v6 = vmul.f32 %v1446_v60, %v1446_v60  ;;  %v1313_v46 = vadd.f32 %v2603_v15, %v1312_v61 }
 0x140   : > { %v1496_v8 = vadd.f32 %v1495_v1, %v1494_v36 }
 0x141   : > { %1479 = vst.msk [vmem:[%s2613_s18 + $0x4] sm:$0xf] %vm1477_vm8, %v1462_v29  ;;  %v1548_v16 = vsel %vm1003_vm5, %v1532_v6, 0.0  ;;  %v1362_v41 = vadd.f32 %v1361_v57, %v1313_v46 }
 0x142   : > { %v1549_v12 = vadd.f32 %v1548_v16, %v1547_v18 }
 0x143   : > { %v1411_v2 = vadd.f32 %v1410_v11, %v1362_v41  ;;  %v2654_v50 = vpop.f32.mrf.mxu2 }
 0x144   : > { %v1366_v10 = vpop.f32.mrf.mxu1 }
 0x145   : > { %v1447_v4 = vmax.f32 %v1411_v2, 0.0  ;;  %v1337_v35 = vpop.f32.mrf.mxu3 }
 0x146   : > { %v1314_v14 = vpop.f32.mrf.mxu0  ;;  %v1338_v1 = vadd.f32 %v2603_v15, %v1337_v35 }
 0x147   : > { %v1463_v17 = vpack.c.bf16 %v1447_v4, %v1447_v4  ;;  %v1497_v39 = vsel %vm1003_vm5, %v1447_v4, 0.0  ;;  %v1533_v53 = vmul.f32 %v1447_v4, %v1447_v4  ;;  %v1315_v7 = vadd.f32 %v2603_v15, %v1314_v14 }
 0x148   : > { %v2627_v34 = vadd.f32 %v1497_v39, %v1496_v8 }
 0x149   : > { %1480 = vst.msk [vmem:[%s2613_s18 + $0x8] sm:$0xf] %vm1477_vm8, %v1463_v17  ;;  %v1550_v38 = vsel %vm1003_vm5, %v1533_v53, 0.0  ;;  %v1364_v44 = vadd.f32 %v1363_v30, %v1315_v7 }
 0x14a   : > { %v2632_v0 = vadd.f32 %v1550_v38, %v1549_v12 }
 0x14b   : > { %v1413_v19 = vadd.f32 %v1412_v45, %v1364_v44  ;;  %v2665_v57 = vpop.f32.mrf.mxu2 }
 0x14c   : > { %v1368_v33 = vpop.f32.mrf.mxu1 }
 0x14d   : > { %v2634_v20 = vmax.f32 %v1413_v19, 0.0  ;;  %v1339_v42 = vpop.f32.mrf.mxu3 }
 0x14e   : > { %v1317_v22 = vpop.f32.mrf.mxu0  ;;  %v1340_v14 = vadd.f32 %v2603_v15, %v1339_v42 }
 0x14f   : > { %v1464_v52 = vpack.c.bf16 %v2634_v20, %v2634_v20  ;;  %v1318_v25 = vadd.f32 %v2603_v15, %v1317_v22 }
 0x151   : > { %1481 = vst.msk [vmem:[%s2613_s18 + $0xc] sm:$0xf] %vm1477_vm8, %v1464_v52  ;;  %v1367_v62 = vadd.f32 %v1366_v10, %v1318_v25 }
 0x153   : > { %v1416_v5 = vadd.f32 %v1415_v49, %v1367_v62  ;;  %v1435_v29 = vpop.f32.mrf.mxu2  ;;  %v1534_v62 = vmul.f32 %v2634_v20, %v2634_v20 }
 0x155   : > { %v2641_v27 = vmax.f32 %v1416_v5, 0.0  ;;  %v1499_v5 = vsel %vm1003_vm5, %v2634_v20, 0.0 }
 0x156   : > { %v1319_v37 = vpop.f32.mrf.mxu0 }
 0x157   : > { %v1465_v40 = vpack.c.bf16 %v2641_v27, %v2641_v27  ;;  %v1320_v63 = vadd.f32 %v2603_v15, %v1319_v37  ;;  %v1501_v37 = vsel %vm1003_vm5, %v2641_v27, 0.0 }
 0x159   : > { %1482 = vst.msk [vmem:[%s2613_s18 + $0x10] sm:$0xf] %vm1477_vm8, %v1465_v40  ;;  %v1369_v31 = vadd.f32 %v1368_v33, %v1320_v63  ;;  %v1552_v33 = vsel %vm1003_vm5, %v1534_v62, 0.0 }
 0x15b   : > { %v1418_v24 = vadd.f32 %v2605_v48, %v1369_v31  ;;  %v1437_v38 = vpop.f32.mrf.mxu2  ;;  %v1500_v31 = vadd.f32 %v1499_v5, %v2627_v34 }
 0x15c   : > { %v1371_v45 = vpop.f32.mrf.mxu1 }
 0x15d   : > { %v2649_v11 = vmax.f32 %v1418_v24, 0.0  ;;  %v1342_v43 = vpop.f32.mrf.mxu3 }
 0x15e   : > { %v1322_v49 = vpop.f32.mrf.mxu0  ;;  %v1343_v42 = vadd.f32 %v2603_v15, %v1342_v43 }
 0x15f   : > { %v1466_v47 = vpack.c.bf16 %v2649_v11, %v2649_v11  ;;  %v1323_v9 = vadd.f32 %v2603_v15, %v1322_v49  ;;  %v1536_v40 = vmul.f32 %v2649_v11, %v2649_v11 }
 0x161   : > { %1483 = vst.msk [vmem:[%s2613_s18 + $0x14] sm:$0xf] %vm1477_vm8, %v1466_v47  ;;  %v1372_v23 = vadd.f32 %v1371_v45, %v1323_v9  ;;  %v1503_v45 = vsel %vm1003_vm5, %v2649_v11, 0.0  ;;  %v1556_v43 = vsel %vm1003_vm5, %v1536_v40, 0.0 }
 0x163   : > { %v1421_v54 = vadd.f32 %v1420_v56, %v1372_v23  ;;  %v1440_v9 = vpop.f32.mrf.mxu2  ;;  %v1553_v23 = vadd.f32 %v1552_v33, %v2632_v0 }
 0x164   : > { %v1373_v28 = vpop.f32.mrf.mxu1 }
 0x165   : > { %v2658_v51 = vmax.f32 %v1421_v54, 0.0  ;;  %v2669_v60 = vpop.f32.mrf.mxu3  ;;  %v1502_v54 = vadd.f32 %v1501_v37, %v1500_v31 }
 0x166   : > { %v1324_v48 = vpop.f32.mrf.mxu0 }
 0x167   : > { %v1467_v55 = vpack.c.bf16 %v2658_v51, %v2658_v51  ;;  %v1325_v13 = vadd.f32 %v2603_v15, %v1324_v48  ;;  %v1537_v49 = vmul.f32 %v2658_v51, %v2658_v51 }
 0x169   : > { %1484 = vst.msk [vmem:[%s2613_s18 + $0x18] sm:$0xf] %vm1477_vm8, %v1467_v55  ;;  %v1374_v26 = vadd.f32 %v1373_v28, %v1325_v13  ;;  %v1505_v55 = vsel %vm1003_vm5, %v2658_v51, 0.0  ;;  %v1504_v28 = vadd.f32 %v1503_v45, %v1502_v54 }
 0x16b   : > { %v1423_v58 = vadd.f32 %v1422_v21, %v1374_v26 }
 0x16d   : > { %v2667_v59 = vmax.f32 %v1423_v58, 0.0 }
 0x16e   : > { %v1327_v56 = vpop.f32.mrf.mxu0 }
 0x16f   : > { %v1468_v36 = vpack.c.bf16 %v2667_v59, %v2667_v59  ;;  %v1328_v61 = vadd.f32 %v2603_v15, %v1327_v56  ;;  %v1538_v34 = vmul.f32 %v2667_v59, %v2667_v59  ;;  %v1558_v56 = vsel %vm1003_vm5, %v1537_v49, 0.0 }
 0x170   : > { %v1507_v0 = vsel %vm1003_vm5, %v2667_v59, 0.0 }
 0x171   : > { %1485 = vst.msk [vmem:[%s2613_s18 + $0x1c] sm:$0xf] %vm1477_vm8, %v1468_v36 }
 0x174   : > { %v1376_v6 = vpop.f32.mrf.mxu1 }
 0x175   : > { %v1377_v46 = vadd.f32 %v1376_v6, %v1328_v61  ;;  %v1386_v8 = vpop.f32.mrf.mxu3  ;;  %v1560_v6 = vsel %vm1003_vm5, %v1538_v34, 0.0 }
 0x176   : > { %v1387_v18 = vadd.f32 %v1386_v8, %v1338_v1  ;;  %v1329_v41 = vpop.f32.mrf.mxu0  ;;  %v1506_v1 = vadd.f32 %v1505_v55, %v1504_v28 }
 0x177   : > { %v1426_v16 = vadd.f32 %v1425_v3, %v1377_v46  ;;  %v1330_v4 = vadd.f32 %v2603_v15, %v1329_v41  ;;  %v1345_v41 = vadd.f32 %v2603_v15, %v2669_v60 }
 0x178   : > { %v1436_v21 = vadd.f32 %v1435_v29, %v1387_v18  ;;  %v1508_v59 = vadd.f32 %v1507_v0, %v1506_v1 }
 0x179   : > { %v1453_v12 = vmax.f32 %v1426_v16, 0.0 }
 0x17a   : > { %v2677_v2 = vmax.f32 %v1436_v21, 0.0 }
 0x17b   : > { %v1469_v30 = vpack.c.bf16 %v1453_v12, %v1453_v12  ;;  %v1539_v36 = vmul.f32 %v1453_v12, %v1453_v12  ;;  %v1509_v51 = vsel %vm1003_vm5, %v1453_v12, 0.0 }
 0x17c   : > { %v1473_v17 = vpack.c.bf16 %v2677_v2, %v2677_v2  ;;  %v1378_v39 = vpop.f32.mrf.mxu1  ;;  %v1543_v33 = vmul.f32 %v2677_v2, %v2677_v2 }
 0x17d   : > { %1486 = vst.msk [vmem:[%s2613_s18 + $0x20] sm:$0xf] %vm1477_vm8, %v1469_v30  ;;  %v1379_v53 = vadd.f32 %v1378_v39, %v1330_v4  ;;  %v1388_v7 = vpop.f32.mrf.mxu3  ;;  %v1562_v4 = vsel %vm1003_vm5, %v1539_v36, 0.0 }
 0x17e   : > { %1490 = vst.msk [vmem:[%s2613_s18 + $0x30] sm:$0xf] %vm1477_vm8, %v1473_v17  ;;  %v1389_v44 = vadd.f32 %v1388_v7, %v1340_v14  ;;  %v1332_v35 = vpop.f32.mrf.mxu0 }
 0x17f   : > { %v1428_v19 = vadd.f32 %v1427_v32, %v1379_v53  ;;  %v1535_v32 = vmul.f32 %v2641_v27, %v2641_v27  ;;  %v1333_v63 = vadd.f32 %v2603_v15, %v1332_v35  ;;  %v1510_v53 = vadd.f32 %v1509_v51, %v1508_v59 }
 0x180   : > { %v1438_v3 = vadd.f32 %v1437_v38, %v1389_v44 }
 0x181   : > { %v1454_v10 = vmax.f32 %v1428_v19, 0.0  ;;  %v1554_v20 = vsel %vm1003_vm5, %v1535_v32, 0.0  ;;  %v1442_v19 = vpop.f32.mrf.mxu2 }
 0x182   : > { %v2687_v22 = vmax.f32 %v1438_v3, 0.0  ;;  %v1555_v13 = vadd.f32 %v1554_v20, %v1553_v23 }
 0x183   : > { %v1470_v52 = vpack.c.bf16 %v1454_v10, %v1454_v10  ;;  %v1511_v14 = vsel %vm1003_vm5, %v1454_v10, 0.0 }
 0x184   : > { %v1474_v25 = vpack.c.bf16 %v2687_v22, %v2687_v22  ;;  %v1557_v29 = vadd.f32 %v1556_v43, %v1555_v13  ;;  %v1544_v20 = vmul.f32 %v2687_v22, %v2687_v22 }
 0x185   : > { %1487 = vst.msk [vmem:[%s2613_s18 + $0x24] sm:$0xf] %vm1477_vm8, %v1470_v52  ;;  %v1512_v52 = vadd.f32 %v1511_v14, %v1510_v53 }
 0x186   : > { %1491 = vst.msk [vmem:[%s2613_s18 + $0x34] sm:$0xf] %vm1477_vm8, %v1474_v25  ;;  %v1334_v26 = vpop.f32.mrf.mxu0  ;;  %v1559_v16 = vadd.f32 %v1558_v56, %v1557_v29  ;;  %v1572_v34 = vsel %vm1003_vm5, %v1544_v20, 0.0 }
 0x187   : > { %v1335_v8 = vadd.f32 %v2603_v15, %v1334_v26 }
 0x188   : > { %v1561_v7 = vadd.f32 %v1560_v6, %v1559_v16 }
 0x18a   : > { %v1563_v3 = vadd.f32 %v1562_v4, %v1561_v7 }
 0x18c   : > { %v1381_v24 = vpop.f32.mrf.mxu1 }
 0x18d   : > { %v1382_v47 = vadd.f32 %v1381_v24, %v1333_v63  ;;  %v1391_v27 = vpop.f32.mrf.mxu3  ;;  %v1517_v24 = vsel %vm1003_vm5, %v2677_v2, 0.0 }
 0x18e   : > { %v1392_v48 = vadd.f32 %v1391_v27, %v1343_v42  ;;  %v1570_v27 = vsel %vm1003_vm5, %v1543_v33, 0.0 }
 0x18f   : > { %v1431_v11 = vadd.f32 %v2654_v50, %v1382_v47  ;;  %v1540_v50 = vmul.f32 %v1454_v10, %v1454_v10 }
 0x190   : > { %v1441_v58 = vadd.f32 %v1440_v9, %v1392_v48  ;;  %v1519_v9 = vsel %vm1003_vm5, %v2687_v22, 0.0 }
 0x191   : > { %v1455_v61 = vmax.f32 %v1431_v11, 0.0  ;;  %v1564_v44 = vsel %vm1003_vm5, %v1540_v50, 0.0 }
 0x192   : > { %v1459_v46 = vmax.f32 %v1441_v58, 0.0  ;;  %v1565_v62 = vadd.f32 %v1564_v44, %v1563_v3 }
 0x193   : > { %v1471_v18 = vpack.c.bf16 %v1455_v61, %v1455_v61  ;;  %v1541_v17 = vmul.f32 %v1455_v61, %v1455_v61  ;;  %v1513_v15 = vsel %vm1003_vm5, %v1455_v61, 0.0 }
 0x194   : > { %v1475_v21 = vpack.c.bf16 %v1459_v46, %v1459_v46  ;;  %v1383_v30 = vpop.f32.mrf.mxu1  ;;  %v1514_v5 = vadd.f32 %v1513_v15, %v1512_v52  ;;  %v1545_v23 = vmul.f32 %v1459_v46, %v1459_v46  ;;  %v1521_v48 = vsel %vm1003_vm5, %v1459_v46, 0.0 }
 0x195   : > { %1488 = vst.msk [vmem:[%s2613_s18 + $0x28] sm:$0xf] %vm1477_vm8, %v1471_v18  ;;  %v1384_v12 = vadd.f32 %v1383_v30, %v1335_v8  ;;  %v1393_v39 = vpop.f32.mrf.mxu3  ;;  %v1566_v25 = vsel %vm1003_vm5, %v1541_v17, 0.0 }
 0x196   : > { %1492 = vst.msk [vmem:[%s2613_s18 + $0x38] sm:$0xf] %vm1477_vm8, %v1475_v21  ;;  %v1394_v38 = vadd.f32 %v1393_v39, %v1345_v41  ;;  %v1574_v13 = vsel %vm1003_vm5, %v1545_v23, 0.0 }
 0x197   : > { %v1433_v60 = vadd.f32 %v2665_v57, %v1384_v12  ;;  %v1567_v57 = vadd.f32 %v1566_v25, %v1565_v62 }
 0x198   : > { %v1443_v10 = vadd.f32 %v1442_v19, %v1394_v38 }
 0x199   : > { %v1456_v35 = vmax.f32 %v1433_v60, 0.0 }
 0x19a   : > { %v1460_v32 = vmax.f32 %v1443_v10, 0.0 }
 0x19b   : > { %v1472_v37 = vpack.c.bf16 %v1456_v35, %v1456_v35  ;;  %v1515_v40 = vsel %vm1003_vm5, %v1456_v35, 0.0  ;;  %v1542_v63 = vmul.f32 %v1456_v35, %v1456_v35 }
 0x19c   : > { %v1516_v31 = vadd.f32 %v1515_v40, %v1514_v5  ;;  %v1476_v42 = vpack.c.bf16 %v1460_v32, %v1460_v32  ;;  %v1546_v43 = vmul.f32 %v1460_v32, %v1460_v32  ;;  %v1523_v28 = vsel %vm1003_vm5, %v1460_v32, 0.0 }
 0x19d   : > { %1489 = vst.msk [vmem:[%s2613_s18 + $0x2c] sm:$0xf] %vm1477_vm8, %v1472_v37  ;;  %v1568_v45 = vsel %vm1003_vm5, %v1542_v63, 0.0 }
 0x19e   : > { %v1518_v49 = vadd.f32 %v1517_v24, %v1516_v31  ;;  %v1569_v47 = vadd.f32 %v1568_v45, %v1567_v57  ;;  %1493 = vst.msk [vmem:[%s2613_s18 + $0x3c] sm:$0xf] %vm1477_vm8, %v1476_v42  ;;  %v1576_v22 = vsel %vm1003_vm5, %v1546_v43, 0.0 }
 0x1a0   : > { %v1571_v2 = vadd.f32 %v1570_v27, %v1569_v47  ;;  %v1520_v54 = vadd.f32 %v1519_v9, %v1518_v49 }
 0x1a2   : > { %v1522_v55 = vadd.f32 %v1521_v48, %v1520_v54  ;;  %v1573_v11 = vadd.f32 %v1572_v34, %v1571_v2 }
 0x1a4   : > { %v1524_v26 = vadd.f32 %v1523_v28, %v1522_v55  ;;  %v1575_v58 = vadd.f32 %v1574_v13, %v1573_v11 }
 0x1a6   : > { %v1525_v56 = vrot.slane %v1524_v26, 4  ;;  %v1577_v0 = vadd.f32 %v1576_v22, %v1575_v58 }
 0x1a8   : > { %v1526_v36 = vadd.f32 %v1525_v56, %v1524_v26  ;;  %v1578_v61 = vrot.slane %v1577_v0, 4 }
 0x1aa   : > { %v1527_v29 = vrot.slane %v1526_v36, 2  ;;  %v1579_v1 = vadd.f32 %v1578_v61, %v1577_v0 }
 0x1ac   : > { %v1528_v6 = vadd.f32 %v1527_v29, %v1526_v36  ;;  %v1580_v46 = vrot.slane %v1579_v1, 2 }
 0x1ae   : > { %v1529_v51 = vrot.slane %v1528_v6, 1  ;;  %v1581_v50 = vadd.f32 %v1580_v46, %v1579_v1 }
 0x1b0   : > { %v1582_v8 = vrot.slane %v1581_v50, 1  ;;  %v1530_v18 = vadd.f32 %v1529_v51, %v1528_v6 }
 0x1b2   : > { %v1583_v16 = vadd.f32 %v1582_v8, %v1581_v50 }
 0x1b4   : > { %v1585_v41 = vsel %vm712_vm0, %v1530_v18, %v1583_v16 }
 0x1b5   : > { %1587 = vst.msk [vmem:[%s440_s9] sm:$0x3] %vm1586_vm9, %v1585_v41 }
 0x1b6 PF: > { %s17_s25 = sadd.s32 1, %s2051_s25   ;;  %s2790_s21 = smov %s2043_s23 }
 0x1b7   : > { %p14_p12 = scmp.ge.s32.totalorder %s17_s25, 6   ;;  %s2791_s22 = smov %s2047_s24 }
 0x1b8   : > { %s2792_s23 = smov %s2795_s26  ;;  %s2793_s24 = smov %s2799_s27 }
 0x1b9   :  { %16 = sbr.rel (!%p14_p12) target bundleno = 3 (0x3), region = 88 }

</bundles_post_ra>
